<compile_context>
chip_gen: v7x
topology: tpu7x:2x2x1
jax: 0.10.0
libtpu: 0.0.40
codegen_flags: <defaults>
</compile_context>

<pallas_src>
import functools

import jax
import jax.numpy as jnp
from jax.experimental import pallas as pl
from jax.experimental.pallas import tpu as pltpu


# --------------------------------------------------------------------------------------
# Kernel 1: fused QKV projection over row tiles of the flattened (B*N, C) sequence.
# --------------------------------------------------------------------------------------
def qkv_projection_kernel(x_ref, wqkv_ref, q_ref, k_ref, v_ref, *, scale):
    C = x_ref.shape[-1]
    x_bf = x_ref[...].astype(jnp.bfloat16)
    # (tm, C) @ (C, 3C) on the MXU, f32 accumulation; the f32 result dies within this tile.
    qkv = jnp.dot(x_bf, wqkv_ref[...], preferred_element_type=jnp.float32)
    q_ref[...] = (qkv[:, :C] * scale).astype(q_ref.dtype)      # fold attention scale into Q once
    k_ref[...] = qkv[:, C:2 * C].astype(k_ref.dtype)
    v_ref[...] = qkv[:, 2 * C:].astype(v_ref.dtype)


# --------------------------------------------------------------------------------------
# Kernel 2: attention + output projection.  One program = one (batch, q-block) tile.
# --------------------------------------------------------------------------------------
def attention_kernel(q_ref, k_ref, v_ref, wproj_ref, bproj_ref, o_ref, ctx_ref, *, num_heads):
    tq, C = q_ref.shape
    N = k_ref.shape[0]
    hd = C // num_heads

    def split_heads(mat):
        # (rows, C) -> (H, rows, hd): pay the head relayout once so all H MXU passes for
        # QK^T / AV are issued from a single batched einsum (no per-head lane slicing
        # around each matmul).
        return jnp.stack([mat[:, h * hd:(h + 1) * hd] for h in range(num_heads)], axis=0)

    q = split_heads(q_ref[...])        # (H, tq, hd) bf16, scale already folded in
    k = split_heads(k_ref[...])        # (H, N,  hd) bf16
    v = split_heads(v_ref[...])        # (H, N,  hd) bf16

    # Scores batched over heads, f32 accumulation on the MXU.
    s = jnp.einsum('hqd,hkd->hqk', q, k, preferred_element_type=jnp.float32)   # (H, tq, N)
    m = jnp.max(s, axis=-1, keepdims=True)
    p = jnp.exp(s - m)                               # softmax math stays f32 (v5e: no bf16 EUP)
    l = jnp.sum(p, axis=-1, keepdims=True)

    av = jnp.einsum('hqk,hkd->hqd', p.astype(jnp.bfloat16), v,
                    preferred_element_type=jnp.float32)                          # (H, tq, hd)
    # Deferred normalization: (H, tq, hd) multiplies instead of (H, tq, N); exact reciprocal
    # (still on the EUP) to keep numerics tight.
    av = av * pl.reciprocal(l, approx=False)

    # Reassemble heads into a lane-contiguous (tq, C) bf16 context buffer, then ONE
    # full-depth projection matmul (contraction depth = C) instead of num_heads K=hd matmuls.
    for h in range(num_heads):
        ctx_ref[:, h * hd:(h + 1) * hd] = av[h].astype(jnp.bfloat16)
    out = jnp.dot(ctx_ref[...], wproj_ref[...], preferred_element_type=jnp.float32)
    o_ref[...] = (out + bproj_ref[...]).astype(o_ref.dtype)


# --------------------------------------------------------------------------------------
# Wrapper
# --------------------------------------------------------------------------------------
def _pick_block(n, preferred):
    for cand in (preferred, 512, 256, 128, 64, 32, 16, 8):
        if cand <= n and n % cand == 0:
            return cand
    return n


def _vmem_limit_bytes(per_step_bytes):
    # Right-size the scoped VMEM request from the actual per-step footprint (+headroom for
    # compiler scratch), clamped comfortably under the smallest physical VMEM (v7x: 64 MiB).
    return int(min(56 * 1024 * 1024, max(4 * 1024 * 1024, 2 * per_step_bytes)))


@functools.partial(jax.jit, static_argnames=("num_heads", "block_q", "block_rows"))
def attention_forward(x, params, *, num_heads, block_q=None, block_rows=None):
    B, N, C = x.shape
    assert C % num_heads == 0, "dim must be divisible by num_heads"
    hd = C // num_heads
    scale = hd ** -0.5

    # MXU operands in bf16 (f32 accumulation inside the kernels); bias stays f32.
    wqkv = params['wqkv'].astype(jnp.bfloat16)
    wproj = params['wproj'].astype(jnp.bfloat16)
    bproj = params['bproj'].astype(jnp.float32)

    # ---------------- Kernel 1: QKV projection ----------------
    BN = B * N
    tm = block_rows or _pick_block(BN, 256)
    assert BN % tm == 0
    x2 = x.reshape(BN, C)

    qkv_step_bytes = (2 * tm * C * x.dtype.itemsize          # x tile (double-buffered)
                      + 2 * C * 3 * C * 2                    # Wqkv bf16 (double-buffered)
                      + 2 * 3 * tm * C * 2                   # q/k/v out tiles (double-buffered)
                      + tm * 3 * C * 4 + tm * C * 4)         # f32 qkv intermediate + bf16 x
    qkv_cost = pl.CostEstimate(
        flops=2 * BN * C * 3 * C,
        transcendentals=0,
        bytes_accessed=BN * C * x.dtype.itemsize + C * 3 * C * 2 + 3 * BN * C * 2)

    q, k, v = pl.pallas_call(
        functools.partial(qkv_projection_kernel, scale=scale),
        out_shape=tuple(jax.ShapeDtypeStruct((BN, C), jnp.bfloat16) for _ in range(3)),
        grid=(BN // tm,),
        in_specs=[
            pl.BlockSpec((tm, C), lambda i: (i, 0)),           # x row tile
            pl.BlockSpec((C, 3 * C), lambda i: (0, 0)),        # Wqkv (constant block)
        ],
        out_specs=tuple(pl.BlockSpec((tm, C), lambda i: (i, 0)) for _ in range(3)),
        compiler_params=pltpu.CompilerParams(
            dimension_semantics=("parallel",),
            vmem_limit_bytes=_vmem_limit_bytes(qkv_step_bytes)),
        cost_estimate=qkv_cost,
    )(x2, wqkv)

    q = q.reshape(B, N, C)
    k = k.reshape(B, N, C)
    v = v.reshape(B, N, C)

    # ---------------- Kernel 2: attention + output projection ----------------
    tq = block_q or _pick_block(N, 128)
    assert N % tq == 0

    attn_step_bytes = (2 * tq * C * 2                         # Q tile (double-buffered)
                       + 2 * 2 * N * C * 2                    # K, V (full seq, double-buffered)
                       + 2 * C * C * 2 + 2 * C * 4            # Wproj + bias
                       + 2 * tq * C * x.dtype.itemsize        # output tile
                       + 2 * num_heads * tq * N * 4           # scores + probs (f32)
                       + num_heads * tq * hd * 4 + tq * C * 2)  # av + ctx scratch
    attn_cost = pl.CostEstimate(
        flops=B * (4 * N * N * C + 2 * N * C * C),
        transcendentals=B * num_heads * N * N,
        bytes_accessed=(B * N * C * 2                         # Q
                        + (N // tq) * B * 2 * N * C * 2       # K, V re-read per Q block
                        + C * C * 2 + C * 4                   # weights
                        + B * N * C * x.dtype.itemsize))      # output

    out = pl.pallas_call(
        functools.partial(attention_kernel, num_heads=num_heads),
        out_shape=jax.ShapeDtypeStruct((B, N, C), x.dtype),
        grid=(B, N // tq),
        in_specs=[
            pl.BlockSpec((None, tq, C), lambda b, i: (b, i, 0)),   # Q tile
            pl.BlockSpec((None, N, C), lambda b, i: (b, 0, 0)),    # K (full sequence, resident)
            pl.BlockSpec((None, N, C), lambda b, i: (b, 0, 0)),    # V (full sequence, resident)
            pl.BlockSpec((C, C), lambda b, i: (0, 0)),             # Wproj (constant block)
            pl.BlockSpec((1, C), lambda b, i: (0, 0)),             # proj bias
        ],
        out_specs=pl.BlockSpec((None, tq, C), lambda b, i: (b, i, 0)),
        scratch_shapes=[pltpu.VMEM((tq, C), jnp.bfloat16)],        # lane-dense context buffer
        compiler_params=pltpu.CompilerParams(
            dimension_semantics=("parallel", "parallel"),
            vmem_limit_bytes=_vmem_limit_bytes(attn_step_bytes)),
        cost_estimate=attn_cost,
    )(q, k, v, wproj, bproj)

    return out


def reference(x, params, num_heads):
    """Pure-JAX f32 reference mirroring the PyTorch forward exactly."""
    B, N, C = x.shape
    hd = C // num_heads
    qkv = x @ params['wqkv']                                            # (B, N, 3C)
    qkv = qkv.reshape(B, N, 3, num_heads, hd).transpose(2, 0, 3, 1, 4)  # (3, B, H, N, hd)
    q, k, v = qkv[0], qkv[1], qkv[2]
    attn = jax.nn.softmax((q @ jnp.swapaxes(k, -1, -2)) * (hd ** -0.5), axis=-1)
    out = (attn @ v).transpose(0, 2, 1, 3).reshape(B, N, C)
    return out @ params['wproj'] + params['bproj']


if __name__ == "__main__":
    # Small but TPU-realistic shapes: lane-dense C (multiple of 128) and head_dim = 64
    # (production MBT/ViT head size, so per-head MXU contraction depth is realistic).
    B, N, C = 2, 128, 256
    num_heads = 4

    key = jax.random.PRNGKey(0)
    k0, k1, k2, k3 = jax.random.split(key, 4)
    params = {
        'wqkv':  0.05 * jax.random.normal(k0, (C, 3 * C), jnp.float32),   # qkv_bias=False
        'wproj': 0.05 * jax.random.normal(k1, (C, C), jnp.float32),
        'bproj': 0.01 * jax.random.normal(k2, (1, C), jnp.float32),
    }
    x = jax.random.normal(k3, (B, N, C), jnp.float32)

    out = jax.block_until_ready(
        attention_forward(x, params, num_heads=num_heads, block_q=32, block_rows=64))
    ref = reference(x, params, num_heads)

    assert out.shape == (B, N, C)
    # bf16 MXU operands (incl. bf16 probabilities for AV) vs f32 reference -> loose comparison.
    max_err = float(jnp.max(jnp.abs(out - ref)))
    assert jnp.allclose(out, ref, atol=3e-2, rtol=3e-2), \
        f"mismatch vs reference (max abs err {max_err})"
    print("KERNEL_OK")
</pallas_src>

<mosaic_0001>
module attributes {stable_mosaic.version = 11 : i64} {
  func.func @attention_kernel(%arg0: i32, %arg1: i32, %arg2: memref<1x32x256xbf16, #tpu.memory_space<vmem>>, %arg3: memref<1x128x256xbf16, #tpu.memory_space<vmem>>, %arg4: memref<1x128x256xbf16, #tpu.memory_space<vmem>>, %arg5: memref<256x256xbf16, #tpu.memory_space<vmem>>, %arg6: memref<1x256xf32, #tpu.memory_space<vmem>>, %arg7: memref<1x32x256xf32, #tpu.memory_space<vmem>>, %arg8: memref<32x256xbf16, #tpu.memory_space<vmem>>) attributes {dimension_semantics = [#tpu.dimension_semantics<parallel>, #tpu.dimension_semantics<parallel>], iteration_bounds = array<i64: 2, 4>, scalar_prefetch = 0 : i64, scratch_operands = 1 : i64, tpu.core_type = #tpu.core_type<tc>, window_params = [{transform_indices = @transform_0, window_bounds = array<i64: 1, 32, 256>}, {transform_indices = @transform_1, window_bounds = array<i64: 1, 128, 256>}, {transform_indices = @transform_2, window_bounds = array<i64: 1, 128, 256>}, {pipeline_mode = #tpu.pipeline_mode<synchronous>, transform_indices = @transform_3, window_bounds = array<i64: 256, 256>}, {pipeline_mode = #tpu.pipeline_mode<synchronous>, transform_indices = @transform_4, window_bounds = array<i64: 1, 256>}, {transform_indices = @transform_5, window_bounds = array<i64: 1, 32, 256>}]} {
    %c0 = arith.constant 0 : index
    %c0_0 = arith.constant 0 : index
    %c0_1 = arith.constant 0 : index
    %0 = vector.load %arg2[%c0, %c0_0, %c0_1] : memref<1x32x256xbf16, #tpu.memory_space<vmem>>, vector<1x32x256xbf16>
    %1 = vector.shape_cast %0 : vector<1x32x256xbf16> to vector<32x256xbf16>
    %2 = vector.extract_strided_slice %1 {offsets = [0, 0], sizes = [32, 64], strides = [1, 1]} : vector<32x256xbf16> to vector<32x64xbf16>
    %3 = vector.extract_strided_slice %1 {offsets = [0, 64], sizes = [32, 64], strides = [1, 1]} : vector<32x256xbf16> to vector<32x64xbf16>
    %4 = vector.extract_strided_slice %1 {offsets = [0, 128], sizes = [32, 64], strides = [1, 1]} : vector<32x256xbf16> to vector<32x64xbf16>
    %5 = vector.extract_strided_slice %1 {offsets = [0, 192], sizes = [32, 64], strides = [1, 1]} : vector<32x256xbf16> to vector<32x64xbf16>
    %6 = vector.shape_cast %2 : vector<32x64xbf16> to vector<1x32x64xbf16>
    %7 = vector.shape_cast %3 : vector<32x64xbf16> to vector<1x32x64xbf16>
    %8 = vector.shape_cast %4 : vector<32x64xbf16> to vector<1x32x64xbf16>
    %9 = vector.shape_cast %5 : vector<32x64xbf16> to vector<1x32x64xbf16>
    %10 = tpu.concatenate %6, %7, %8, %9 in 0 : vector<1x32x64xbf16>, vector<1x32x64xbf16>, vector<1x32x64xbf16>, vector<1x32x64xbf16> -> vector<4x32x64xbf16>
    %c0_2 = arith.constant 0 : index
    %c0_3 = arith.constant 0 : index
    %c0_4 = arith.constant 0 : index
    %11 = vector.load %arg3[%c0_2, %c0_3, %c0_4] : memref<1x128x256xbf16, #tpu.memory_space<vmem>>, vector<1x128x256xbf16>
    %12 = vector.shape_cast %11 : vector<1x128x256xbf16> to vector<128x256xbf16>
    %13 = vector.extract_strided_slice %12 {offsets = [0, 0], sizes = [128, 64], strides = [1, 1]} : vector<128x256xbf16> to vector<128x64xbf16>
    %14 = vector.extract_strided_slice %12 {offsets = [0, 64], sizes = [128, 64], strides = [1, 1]} : vector<128x256xbf16> to vector<128x64xbf16>
    %15 = vector.extract_strided_slice %12 {offsets = [0, 128], sizes = [128, 64], strides = [1, 1]} : vector<128x256xbf16> to vector<128x64xbf16>
    %16 = vector.extract_strided_slice %12 {offsets = [0, 192], sizes = [128, 64], strides = [1, 1]} : vector<128x256xbf16> to vector<128x64xbf16>
    %17 = vector.shape_cast %13 : vector<128x64xbf16> to vector<1x128x64xbf16>
    %18 = vector.shape_cast %14 : vector<128x64xbf16> to vector<1x128x64xbf16>
    %19 = vector.shape_cast %15 : vector<128x64xbf16> to vector<1x128x64xbf16>
    %20 = vector.shape_cast %16 : vector<128x64xbf16> to vector<1x128x64xbf16>
    %21 = tpu.concatenate %17, %18, %19, %20 in 0 : vector<1x128x64xbf16>, vector<1x128x64xbf16>, vector<1x128x64xbf16>, vector<1x128x64xbf16> -> vector<4x128x64xbf16>
    %c0_5 = arith.constant 0 : index
    %c0_6 = arith.constant 0 : index
    %c0_7 = arith.constant 0 : index
    %22 = vector.load %arg4[%c0_5, %c0_6, %c0_7] : memref<1x128x256xbf16, #tpu.memory_space<vmem>>, vector<1x128x256xbf16>
    %23 = vector.shape_cast %22 : vector<1x128x256xbf16> to vector<128x256xbf16>
    %24 = vector.extract_strided_slice %23 {offsets = [0, 0], sizes = [128, 64], strides = [1, 1]} : vector<128x256xbf16> to vector<128x64xbf16>
    %25 = vector.extract_strided_slice %23 {offsets = [0, 64], sizes = [128, 64], strides = [1, 1]} : vector<128x256xbf16> to vector<128x64xbf16>
    %26 = vector.extract_strided_slice %23 {offsets = [0, 128], sizes = [128, 64], strides = [1, 1]} : vector<128x256xbf16> to vector<128x64xbf16>
    %27 = vector.extract_strided_slice %23 {offsets = [0, 192], sizes = [128, 64], strides = [1, 1]} : vector<128x256xbf16> to vector<128x64xbf16>
    %28 = vector.shape_cast %24 : vector<128x64xbf16> to vector<1x128x64xbf16>
    %29 = vector.shape_cast %25 : vector<128x64xbf16> to vector<1x128x64xbf16>
    %30 = vector.shape_cast %26 : vector<128x64xbf16> to vector<1x128x64xbf16>
    %31 = vector.shape_cast %27 : vector<128x64xbf16> to vector<1x128x64xbf16>
    %32 = tpu.concatenate %28, %29, %30, %31 in 0 : vector<1x128x64xbf16>, vector<1x128x64xbf16>, vector<1x128x64xbf16>, vector<1x128x64xbf16> -> vector<4x128x64xbf16>
    "tpu.trace_start"() <{level = 10 : i32, message = "hqd,hkd->hqk"}> : () -> ()
    %cst = arith.constant dense<0.000000e+00> : vector<4x32x128xf32>
    %33 = tpu.matmul %10, %21, %cst {dimension_numbers = #tpu.dot_dimension_numbers<[2], [2], [1], [1], [0, 0, 0, 1, 1, 1], [0], [0]>} : vector<4x32x64xbf16>, vector<4x128x64xbf16>, vector<4x32x128xf32> -> vector<4x32x128xf32>
    "tpu.trace_stop"() : () -> ()
    %cst_8 = arith.constant dense<0xFF800000> : vector<4x32xf32>
    %34 = vector.multi_reduction <maximumf>, %33, %cst_8 [2] : vector<4x32x128xf32> to vector<4x32xf32>
    %35 = vector.shape_cast %34 : vector<4x32xf32> to vector<4x32x1xf32>
    %36 = vector.broadcast %35 : vector<4x32x1xf32> to vector<4x32x128xf32>
    %37 = arith.subf %33, %36 : vector<4x32x128xf32>
    %38 = math.exp %37 : vector<4x32x128xf32>
    %cst_9 = arith.constant dense<0.000000e+00> : vector<4x32xf32>
    %39 = vector.multi_reduction <add>, %38, %cst_9 [2] : vector<4x32x128xf32> to vector<4x32xf32>
    %40 = vector.shape_cast %39 : vector<4x32xf32> to vector<4x32x1xf32>
    %41 = arith.truncf %38 : vector<4x32x128xf32> to vector<4x32x128xbf16>
    "tpu.trace_start"() <{level = 10 : i32, message = "hqk,hkd->hqd"}> : () -> ()
    %cst_10 = arith.constant dense<0.000000e+00> : vector<4x32x64xf32>
    %42 = tpu.matmul %41, %32, %cst_10 {dimension_numbers = #tpu.dot_dimension_numbers<[2], [1], [1], [2], [0, 0, 0, 1, 1, 2], [0], [0]>} : vector<4x32x128xbf16>, vector<4x128x64xbf16>, vector<4x32x64xf32> -> vector<4x32x64xf32>
    "tpu.trace_stop"() : () -> ()
    %43 = tpu.reciprocal %40 : vector<4x32x1xf32> -> vector<4x32x1xf32>
    %44 = vector.broadcast %43 : vector<4x32x1xf32> to vector<4x32x64xf32>
    %45 = arith.mulf %42, %44 : vector<4x32x64xf32>
    %46 = vector.extract_strided_slice %45 {offsets = [0, 0, 0], sizes = [1, 32, 64], strides = [1, 1, 1]} : vector<4x32x64xf32> to vector<1x32x64xf32>
    %47 = vector.shape_cast %46 : vector<1x32x64xf32> to vector<32x64xf32>
    %48 = arith.truncf %47 : vector<32x64xf32> to vector<32x64xbf16>
    %c0_11 = arith.constant 0 : index
    %c0_12 = arith.constant 0 : index
    %49 = vector.load %arg8[%c0_11, %c0_12] : memref<32x256xbf16, #tpu.memory_space<vmem>>, vector<32x64xbf16>
    tpu.vector_store %arg8[%c0_11, %c0_12], %48 {strides = array<i32>} : memref<32x256xbf16, #tpu.memory_space<vmem>>, vector<32x64xbf16>,
    %50 = vector.extract_strided_slice %45 {offsets = [1, 0, 0], sizes = [1, 32, 64], strides = [1, 1, 1]} : vector<4x32x64xf32> to vector<1x32x64xf32>
    %51 = vector.shape_cast %50 : vector<1x32x64xf32> to vector<32x64xf32>
    %52 = arith.truncf %51 : vector<32x64xf32> to vector<32x64xbf16>
    %c0_13 = arith.constant 0 : index
    %c64 = arith.constant 64 : index
    %53 = vector.load %arg8[%c0_13, %c64] : memref<32x256xbf16, #tpu.memory_space<vmem>>, vector<32x64xbf16>
    tpu.vector_store %arg8[%c0_13, %c64], %52 {strides = array<i32>} : memref<32x256xbf16, #tpu.memory_space<vmem>>, vector<32x64xbf16>,
    %54 = vector.extract_strided_slice %45 {offsets = [2, 0, 0], sizes = [1, 32, 64], strides = [1, 1, 1]} : vector<4x32x64xf32> to vector<1x32x64xf32>
    %55 = vector.shape_cast %54 : vector<1x32x64xf32> to vector<32x64xf32>
    %56 = arith.truncf %55 : vector<32x64xf32> to vector<32x64xbf16>
    %c0_14 = arith.constant 0 : index
    %c128 = arith.constant 128 : index
    %57 = vector.load %arg8[%c0_14, %c128] : memref<32x256xbf16, #tpu.memory_space<vmem>>, vector<32x64xbf16>
    tpu.vector_store %arg8[%c0_14, %c128], %56 {strides = array<i32>} : memref<32x256xbf16, #tpu.memory_space<vmem>>, vector<32x64xbf16>,
    %58 = vector.extract_strided_slice %45 {offsets = [3, 0, 0], sizes = [1, 32, 64], strides = [1, 1, 1]} : vector<4x32x64xf32> to vector<1x32x64xf32>
    %59 = vector.shape_cast %58 : vector<1x32x64xf32> to vector<32x64xf32>
    %60 = arith.truncf %59 : vector<32x64xf32> to vector<32x64xbf16>
    %c0_15 = arith.constant 0 : index
    %c192 = arith.constant 192 : index
    %61 = vector.load %arg8[%c0_15, %c192] : memref<32x256xbf16, #tpu.memory_space<vmem>>, vector<32x64xbf16>
    tpu.vector_store %arg8[%c0_15, %c192], %60 {strides = array<i32>} : memref<32x256xbf16, #tpu.memory_space<vmem>>, vector<32x64xbf16>,
    %c0_16 = arith.constant 0 : index
    %c0_17 = arith.constant 0 : index
    %62 = vector.load %arg8[%c0_16, %c0_17] : memref<32x256xbf16, #tpu.memory_space<vmem>>, vector<32x256xbf16>
    %c0_18 = arith.constant 0 : index
    %c0_19 = arith.constant 0 : index
    %63 = vector.load %arg5[%c0_18, %c0_19] : memref<256x256xbf16, #tpu.memory_space<vmem>>, vector<256x256xbf16>
    %cst_20 = arith.constant dense<0.000000e+00> : vector<32x256xf32>
    %64 = tpu.matmul %62, %63, %cst_20 {dimension_numbers = #tpu.dot_dimension_numbers<[1], [0], [0], [1], [0, 0, 1, 1], [], []>} : vector<32x256xbf16>, vector<256x256xbf16>, vector<32x256xf32> -> vector<32x256xf32>
    %c0_21 = arith.constant 0 : index
    %c0_22 = arith.constant 0 : index
    %65 = vector.load %arg6[%c0_21, %c0_22] : memref<1x256xf32, #tpu.memory_space<vmem>>, vector<1x256xf32>
    %66 = vector.broadcast %65 : vector<1x256xf32> to vector<32x256xf32>
    %67 = arith.addf %64, %66 : vector<32x256xf32>
    %c0_23 = arith.constant 0 : index
    %c0_24 = arith.constant 0 : index
    %c0_25 = arith.constant 0 : index
    %68 = vector.load %arg7[%c0_23, %c0_24, %c0_25] : memref<1x32x256xf32, #tpu.memory_space<vmem>>, vector<1x32x256xf32>
    %69 = vector.shape_cast %68 : vector<1x32x256xf32> to vector<32x256xf32>
    %70 = vector.shape_cast %67 : vector<32x256xf32> to vector<1x32x256xf32>
    tpu.vector_store %arg7[%c0_23, %c0_24, %c0_25], %70 {strides = array<i32>} : memref<1x32x256xf32, #tpu.memory_space<vmem>>, vector<1x32x256xf32>,
    return
  }
  func.func @transform_0(%arg0: i32, %arg1: i32) -> (i32, i32, i32) {
    %c0_i32 = arith.constant 0 : i32
    %c0_i32_0 = arith.constant 0 : i32
    return %arg0, %arg1, %c0_i32 : i32, i32, i32
  }
  func.func @transform_1(%arg0: i32, %arg1: i32) -> (i32, i32, i32) {
    %c0_i32 = arith.constant 0 : i32
    %c0_i32_0 = arith.constant 0 : i32
    %c0_i32_1 = arith.constant 0 : i32
    return %arg0, %c0_i32, %c0_i32_0 : i32, i32, i32
  }
  func.func @transform_2(%arg0: i32, %arg1: i32) -> (i32, i32, i32) {
    %c0_i32 = arith.constant 0 : i32
    %c0_i32_0 = arith.constant 0 : i32
    %c0_i32_1 = arith.constant 0 : i32
    return %arg0, %c0_i32, %c0_i32_0 : i32, i32, i32
  }
  func.func @transform_3(%arg0: i32, %arg1: i32) -> (i32, i32) {
    %c0_i32 = arith.constant 0 : i32
    %c0_i32_0 = arith.constant 0 : i32
    %c0_i32_1 = arith.constant 0 : i32
    return %c0_i32, %c0_i32_0 : i32, i32
  }
  func.func @transform_4(%arg0: i32, %arg1: i32) -> (i32, i32) {
    %c0_i32 = arith.constant 0 : i32
    %c0_i32_0 = arith.constant 0 : i32
    %c0_i32_1 = arith.constant 0 : i32
    return %c0_i32, %c0_i32_0 : i32, i32
  }
  func.func @transform_5(%arg0: i32, %arg1: i32) -> (i32, i32, i32) {
    %c0_i32 = arith.constant 0 : i32
    %c0_i32_0 = arith.constant 0 : i32
    return %arg0, %arg1, %c0_i32 : i32, i32, i32
  }
}

module attributes {stable_mosaic.version = 11 : i64} {
  func.func @qkv_projection_kernel(%arg0: i32, %arg1: memref<64x256xf32, #tpu.memory_space<vmem>>, %arg2: memref<256x768xbf16, #tpu.memory_space<vmem>>, %arg3: memref<64x256xbf16, #tpu.memory_space<vmem>>, %arg4: memref<64x256xbf16, #tpu.memory_space<vmem>>, %arg5: memref<64x256xbf16, #tpu.memory_space<vmem>>) attributes {dimension_semantics = [#tpu.dimension_semantics<parallel>], iteration_bounds = array<i64: 4>, scalar_prefetch = 0 : i64, scratch_operands = 0 : i64, tpu.core_type = #tpu.core_type<tc>, window_params = [{transform_indices = @transform_0, window_bounds = array<i64: 64, 256>}, {pipeline_mode = #tpu.pipeline_mode<synchronous>, transform_indices = @transform_1, window_bounds = array<i64: 256, 768>}, {transform_indices = @transform_2, window_bounds = array<i64: 64, 256>}, {transform_indices = @transform_3, window_bounds = array<i64: 64, 256>}, {transform_indices = @transform_4, window_bounds = array<i64: 64, 256>}]} {
    %c0 = arith.constant 0 : index
    %c0_0 = arith.constant 0 : index
    %0 = vector.load %arg1[%c0, %c0_0] : memref<64x256xf32, #tpu.memory_space<vmem>>, vector<64x256xf32>
    %1 = arith.truncf %0 : vector<64x256xf32> to vector<64x256xbf16>
    %c0_1 = arith.constant 0 : index
    %c0_2 = arith.constant 0 : index
    %2 = vector.load %arg2[%c0_1, %c0_2] : memref<256x768xbf16, #tpu.memory_space<vmem>>, vector<256x768xbf16>
    %cst = arith.constant dense<0.000000e+00> : vector<64x768xf32>
    %3 = tpu.matmul %1, %2, %cst {dimension_numbers = #tpu.dot_dimension_numbers<[1], [0], [0], [1], [0, 0, 1, 1], [], []>} : vector<64x256xbf16>, vector<256x768xbf16>, vector<64x768xf32> -> vector<64x768xf32>
    %4 = vector.extract_strided_slice %3 {offsets = [0, 0], sizes = [64, 256], strides = [1, 1]} : vector<64x768xf32> to vector<64x256xf32>
    %cst_3 = arith.constant 1.250000e-01 : f32
    %5 = vector.broadcast %cst_3 : f32 to vector<64x256xf32>
    %6 = arith.mulf %4, %5 : vector<64x256xf32>
    %7 = arith.truncf %6 : vector<64x256xf32> to vector<64x256xbf16>
    %c0_4 = arith.constant 0 : index
    %c0_5 = arith.constant 0 : index
    %8 = vector.load %arg3[%c0_4, %c0_5] : memref<64x256xbf16, #tpu.memory_space<vmem>>, vector<64x256xbf16>
    tpu.vector_store %arg3[%c0_4, %c0_5], %7 {strides = array<i32>} : memref<64x256xbf16, #tpu.memory_space<vmem>>, vector<64x256xbf16>,
    %9 = vector.extract_strided_slice %3 {offsets = [0, 256], sizes = [64, 256], strides = [1, 1]} : vector<64x768xf32> to vector<64x256xf32>
    %10 = arith.truncf %9 : vector<64x256xf32> to vector<64x256xbf16>
    %c0_6 = arith.constant 0 : index
    %c0_7 = arith.constant 0 : index
    %11 = vector.load %arg4[%c0_6, %c0_7] : memref<64x256xbf16, #tpu.memory_space<vmem>>, vector<64x256xbf16>
    tpu.vector_store %arg4[%c0_6, %c0_7], %10 {strides = array<i32>} : memref<64x256xbf16, #tpu.memory_space<vmem>>, vector<64x256xbf16>,
    %12 = vector.extract_strided_slice %3 {offsets = [0, 512], sizes = [64, 256], strides = [1, 1]} : vector<64x768xf32> to vector<64x256xf32>
    %13 = arith.truncf %12 : vector<64x256xf32> to vector<64x256xbf16>
    %c0_8 = arith.constant 0 : index
    %c0_9 = arith.constant 0 : index
    %14 = vector.load %arg5[%c0_8, %c0_9] : memref<64x256xbf16, #tpu.memory_space<vmem>>, vector<64x256xbf16>
    tpu.vector_store %arg5[%c0_8, %c0_9], %13 {strides = array<i32>} : memref<64x256xbf16, #tpu.memory_space<vmem>>, vector<64x256xbf16>,
    return
  }
  func.func @transform_0(%arg0: i32) -> (i32, i32) {
    %c0_i32 = arith.constant 0 : i32
    %c0_i32_0 = arith.constant 0 : i32
    return %arg0, %c0_i32 : i32, i32
  }
  func.func @transform_1(%arg0: i32) -> (i32, i32) {
    %c0_i32 = arith.constant 0 : i32
    %c0_i32_0 = arith.constant 0 : i32
    %c0_i32_1 = arith.constant 0 : i32
    return %c0_i32, %c0_i32_0 : i32, i32
  }
  func.func @transform_2(%arg0: i32) -> (i32, i32) {
    %c0_i32 = arith.constant 0 : i32
    %c0_i32_0 = arith.constant 0 : i32
    return %arg0, %c0_i32 : i32, i32
  }
  func.func @transform_3(%arg0: i32) -> (i32, i32) {
    %c0_i32 = arith.constant 0 : i32
    %c0_i32_0 = arith.constant 0 : i32
    return %arg0, %c0_i32 : i32, i32
  }
  func.func @transform_4(%arg0: i32) -> (i32, i32) {
    %c0_i32 = arith.constant 0 : i32
    %c0_i32_0 = arith.constant 0 : i32
    return %arg0, %c0_i32 : i32, i32
  }
}

</mosaic_0001>

<bundles_post_ra>
// kernel: attention_forward.2
= control target key start
LH: loop header
LB: loop body
LE: loop exit
PB: predicated region body
PF: predicated region fallthrough
CT: control target
= control target key end

     0   :  { %s1754_s15 = smov 0   ;;  %s2149_s0 = inlined_call_operand.vmem [shape: f32[256,256], index: 0, kind: input, shape index: {}]   ;;  %s2150_s1 = inlined_call_operand.vmem [shape: bf16[256,768], index: 1, kind: input, shape index: {}]   ;;  %s2151_s2 = inlined_call_operand.vmem [shape: bf16[256,256], index: 2, kind: output, shape index: {0}]   ;;  %s2152_s3 = inlined_call_operand.vmem [shape: bf16[256,256], index: 3, kind: output, shape index: {1}]   ;;  %s2153_s4 = inlined_call_operand.vmem [shape: bf16[256,256], index: 4, kind: output, shape index: {2}]  }
   0x1 LB: > { %s1370_s16 = sadd.s32 4294967295, %s1727_s15   ;;  %p1374_p0 = scmp.ge.s32.totalorder %s1727_s15, 1  ;;  %s1727_s15 = sphi %s1754_s15, %s15_s15  }
   0x2   : > { %p169_p1 = scmp.lt.s32.totalorder %s1727_s15, 5 }
   0x4   : > { %p170_p2 = pnand %p1374_p0, %p169_p1 }
   0x5   : > { %v1577_v0 = vld [vmem:[%s2150_s1 + $0x4] ss:$24 sps:$4 sm:$0xff] (!%p170_p2)   ;;  %v1581_v2 = vld [vmem:[%s2150_s1] ss:$24 sps:$4 sm:$0xff] (!%p170_p2)   ;;  %v1583_v4 = vld [vmem:[%s2150_s1 + $0x34] ss:$24 sps:$4 sm:$0xff] (!%p170_p2)  }
   0x6   : > { %173 = sbr.rel (%p170_p2) target bundleno = 361 (0x169), region = 28  ;;  %v1579_v1 = vld [vmem:[%s2150_s1 + $0xc] ss:$24 sps:$4 sm:$0xff] (!%p170_p2)   ;;  %837 = vmatprep.subr.bf16.mxu0 (!%p170_p2), %v1577_v0  ;;  %v1582_v3 = vld [vmem:[%s2150_s1 + $0x8] ss:$24 sps:$4 sm:$0xff] (!%p170_p2)   ;;  %s1375_s29 = sshll.u32 (!%p170_p2), %s1370_s16, 3 }
   0x7   : > { %910 = vmatprep.subr.bf16.mxu1 (!%p170_p2), %v1579_v1  ;;  %838 = vmatpush1.bf16.msra.mxu0 (!%p170_p2), %v1581_v2  ;;  %v1585_v5 = vld [vmem:[%s2150_s1 + $0x3c] ss:$24 sps:$4 sm:$0xff] (!%p170_p2)   ;;  %v1587_v6 = vld [vmem:[%s2150_s1 + $0x30] ss:$24 sps:$4 sm:$0xff] (!%p170_p2)   ;;  %v1591_v9 = vld [vmem:[%s2150_s1 + $0x6c] ss:$24 sps:$4 sm:$0xff] (!%p170_p2)  }
   0x8   : > { %911 = vmatpush1.bf16.msra.mxu1 (!%p170_p2), %v1582_v3  ;;  %839 = vmatprep.subr.bf16.mxu0 (!%p170_p2), %v1583_v4  ;;  %v1588_v7 = vld [vmem:[%s2150_s1 + $0x38] ss:$24 sps:$4 sm:$0xff] (!%p170_p2)   ;;  %v1589_v8 = vld [vmem:[%s2150_s1 + $0x64] ss:$24 sps:$4 sm:$0xff] (!%p170_p2)   ;;  %v1594_v11 = vld [vmem:[%s2150_s1 + $0x68] ss:$24 sps:$4 sm:$0xff] (!%p170_p2)  }
   0x9   : > { %912 = vmatprep.subr.bf16.mxu1 (!%p170_p2), %v1585_v5  ;;  %v1593_v10 = vld [vmem:[%s2150_s1 + $0x60] ss:$24 sps:$4 sm:$0xff] (!%p170_p2)   ;;  %v1595_v12 = vld [vmem:[%s2150_s1 + $0x94] ss:$24 sps:$4 sm:$0xff] (!%p170_p2)   ;;  %v1599_v14 = vld [vmem:[%s2150_s1 + $0x90] ss:$24 sps:$4 sm:$0xff] (!%p170_p2)  }
   0xa   : > { %v1597_v13 = vld [vmem:[%s2150_s1 + $0x9c] ss:$24 sps:$4 sm:$0xff] (!%p170_p2)   ;;  %v1600_v15 = vld [vmem:[%s2150_s1 + $0x98] ss:$24 sps:$4 sm:$0xff] (!%p170_p2)   ;;  %v1603_v17 = vld [vmem:[%s2150_s1 + $0xcc] ss:$24 sps:$4 sm:$0xff] (!%p170_p2)  }
   0xb   : > { %840 = vmatpush1.bf16.msra.mxu0 (!%p170_p2), %v1587_v6  ;;  %v1601_v16 = vld [vmem:[%s2150_s1 + $0xc4] ss:$24 sps:$4 sm:$0xff] (!%p170_p2)   ;;  %v1605_v18 = vld [vmem:[%s2150_s1 + $0xc0] ss:$24 sps:$4 sm:$0xff] (!%p170_p2)   ;;  %v1607_v20 = vld [vmem:[%s2150_s1 + $0xf4] ss:$24 sps:$4 sm:$0xff] (!%p170_p2)  }
   0xc   : > { %913 = vmatpush1.bf16.msra.mxu1 (!%p170_p2), %v1588_v7  ;;  %841 = vmatprep.subr.bf16.mxu0 (!%p170_p2), %v1589_v8  ;;  %v1606_v19 = vld [vmem:[%s2150_s1 + $0xc8] ss:$24 sps:$4 sm:$0xff] (!%p170_p2)   ;;  %v1609_v21 = vld [vmem:[%s2150_s1 + $0xfc] ss:$24 sps:$4 sm:$0xff] (!%p170_p2)   ;;  %v1612_v23 = vld [vmem:[%s2150_s1 + $0xf8] ss:$24 sps:$4 sm:$0xff] (!%p170_p2)  }
   0xd   : > { %914 = vmatprep.subr.bf16.mxu1 %v1591_v9  ;;  %v1611_v22 = vld [vmem:[%s2150_s1 + $0xf0] ss:$24 sps:$4 sm:$0xff]   ;;  %v1613_v24 = vld [vmem:[%s2150_s1 + $0x124] ss:$24 sps:$4 sm:$0xff]   ;;  %v1617_v26 = vld [vmem:[%s2150_s1 + $0x120] ss:$24 sps:$4 sm:$0xff]  }
   0xe   : > { %v1615_v25 = vld [vmem:[%s2150_s1 + $0x12c] ss:$24 sps:$4 sm:$0xff]   ;;  %v1618_v27 = vld [vmem:[%s2150_s1 + $0x128] ss:$24 sps:$4 sm:$0xff]   ;;  %v1621_v29 = vld [vmem:[%s2150_s1 + $0x15c] ss:$24 sps:$4 sm:$0xff]  }
   0xf   : > { %842 = vmatpush1.bf16.msra.mxu0 %v1593_v10  ;;  %v1619_v28 = vld [vmem:[%s2150_s1 + $0x154] ss:$24 sps:$4 sm:$0xff]   ;;  %v1623_v30 = vld [vmem:[%s2150_s1 + $0x150] ss:$24 sps:$4 sm:$0xff]   ;;  %v1625_v32 = vld [vmem:[%s2150_s1 + $0x184] ss:$24 sps:$4 sm:$0xff]  }
  0x10   : > { %915 = vmatpush1.bf16.msra.mxu1 %v1594_v11  ;;  %843 = vmatprep.subr.bf16.mxu0 %v1595_v12  ;;  %v1624_v31 = vld [vmem:[%s2150_s1 + $0x158] ss:$24 sps:$4 sm:$0xff]   ;;  %p210_p3 = scmp.lt.s32.totalorder %s1375_s29, 31  ;;  %v1627_v33 = vld [vmem:[%s2150_s1 + $0x18c] ss:$24 sps:$4 sm:$0xff]  }
  0x11   : > { %916 = vmatprep.subr.bf16.mxu1 %v1597_v13  ;;  %v1629_v34 = vld [vmem:[%s2150_s1 + $0x180] ss:$24 sps:$4 sm:$0xff]   ;;  %v1631_v36 = vld [vmem:[%s2150_s1 + $0x1b4] ss:$24 sps:$4 sm:$0xff]   ;;  %v1635_v38 = vld [vmem:[%s2150_s1 + $0x1b0] ss:$24 sps:$4 sm:$0xff]  }
  0x12   : > { %v1630_v35 = vld [vmem:[%s2150_s1 + $0x188] ss:$24 sps:$4 sm:$0xff]   ;;  %s2155_s29 = smov (!%p210_p3, %s1375_s29), 31  ;;  %v1633_v37 = vld [vmem:[%s2150_s1 + $0x1bc] ss:$24 sps:$4 sm:$0xff]  }
  0x13   : > { %844 = vmatpush1.bf16.msra.mxu0 %v1599_v14  ;;  %v1636_v39 = vld [vmem:[%s2150_s1 + $0x1b8] ss:$24 sps:$4 sm:$0xff]   ;;  %v1637_v40 = vld [vmem:[%s2150_s1 + $0x1e4] ss:$24 sps:$4 sm:$0xff]   ;;  %s1509_s27 = sshll.u32 %s2155_s29, 4  ;;  %s2112_s23 = sshll.u32 %s2155_s29, 3 }
  0x14   : > { %917 = vmatpush1.bf16.msra.mxu1 %v1600_v15  ;;  %845 = vmatprep.subr.bf16.mxu0 %v1601_v16  ;;  %v1639_v41 = vld [vmem:[%s2150_s1 + $0x1ec] ss:$24 sps:$4 sm:$0xff]   ;;  %v1641_v42 = vld [vmem:[%s2150_s1 + $0x1e0] ss:$24 sps:$4 sm:$0xff]   ;;  %s1902_s11 = scalar_lea.vmem %s2149_s0, %s1509_s27  ;;  %v1645_v45 = vld [vmem:[%s2150_s1 + $0x21c] ss:$24 sps:$4 sm:$0xff]   ;;  %s2118_s26 = scalar_lea.vmem %s2152_s3, %s2112_s23 }
  0x15   : > { %918 = vmatprep.subr.bf16.mxu1 %v1603_v17  ;;  %v1642_v43 = vld [vmem:[%s2150_s1 + $0x1e8] ss:$24 sps:$4 sm:$0xff]   ;;  %v1643_v44 = vld [vmem:[%s2150_s1 + $0x214] ss:$24 sps:$4 sm:$0xff]   ;;  %v1648_v48 = vld [vmem:[%s2150_s1 + $0x218] ss:$24 sps:$4 sm:$0xff]   ;;  %s2124_s28 = scalar_lea.vmem %s2151_s2, %s2112_s23  ;;  %s235_s6 = scalar_lea.vmem %s2153_s4, %s2112_s23 }
  0x16   : > { %v238_v46 = vld [vmem:[%s1902_s11 + $0x8] sm:$0xff]  ;;  %v240_v49 = vld [vmem:[%s1902_s11 + $0x18] sm:$0xff]  ;;  %v237_v3 = vld [vmem:[%s1902_s11] sm:$0xff] }
  0x17   : > { %846 = vmatpush1.bf16.msra.mxu0 %v1605_v18  ;;  %v1647_v47 = vld [vmem:[%s2150_s1 + $0x210] ss:$24 sps:$4 sm:$0xff]   ;;  %v1649_v50 = vld [vmem:[%s2150_s1 + $0x244] ss:$24 sps:$4 sm:$0xff]   ;;  %v1921_v51 = vpack.c.bf16 %v240_v49, %v238_v46  ;;  %v1653_v53 = vld [vmem:[%s2150_s1 + $0x240] ss:$24 sps:$4 sm:$0xff]  }
  0x18   : > { %919 = vmatpush1.bf16.msra.mxu1 %v1606_v19  ;;  %847 = vmatprep.subr.bf16.mxu0 %v1607_v20  ;;  %v1651_v52 = vld [vmem:[%s2150_s1 + $0x24c] ss:$24 sps:$4 sm:$0xff]   ;;  %v1654_v54 = vld [vmem:[%s2150_s1 + $0x248] ss:$24 sps:$4 sm:$0xff]   ;;  %v1657_v56 = vld [vmem:[%s2150_s1 + $0x27c] ss:$24 sps:$4 sm:$0xff]  }
  0x19   : > { %920 = vmatprep.subr.bf16.mxu1 %v1609_v21  ;;  %869 = vmatprep.mubr.bf16.mxu0 %v1921_v51  ;;  %v1655_v55 = vld [vmem:[%s2150_s1 + $0x274] ss:$24 sps:$4 sm:$0xff]   ;;  %v1659_v57 = vld [vmem:[%s2150_s1 + $0x270] ss:$24 sps:$4 sm:$0xff]   ;;  %v1661_v59 = vld [vmem:[%s2150_s1 + $0x2a4] ss:$24 sps:$4 sm:$0xff]  }
  0x1a   : > { %942 = vmatprep.mubr.bf16.mxu1 %v1921_v51  ;;  %v1660_v58 = vld [vmem:[%s2150_s1 + $0x278] ss:$24 sps:$4 sm:$0xff]   ;;  %v1663_v60 = vld [vmem:[%s2150_s1 + $0x2ac] ss:$24 sps:$4 sm:$0xff]   ;;  %v1666_v62 = vld [vmem:[%s2150_s1 + $0x2a8] ss:$24 sps:$4 sm:$0xff]  }
  0x1b   : > { %848 = vmatpush1.bf16.msra.mxu0 %v1611_v22  ;;  %v1665_v61 = vld [vmem:[%s2150_s1 + $0x2a0] ss:$24 sps:$4 sm:$0xff]   ;;  %v1667_v63 = vld [vmem:[%s2150_s1 + $0x2d4] ss:$24 sps:$4 sm:$0xff]   ;;  %v1671_v1 = vld [vmem:[%s2150_s1 + $0x2d0] ss:$24 sps:$4 sm:$0xff]  }
  0x1c   : > { %921 = vmatpush1.bf16.msra.mxu1 %v1612_v23  ;;  %849 = vmatprep.subr.bf16.mxu0 %v1613_v24  ;;  %v1669_v0 = vld [vmem:[%s2150_s1 + $0x2dc] ss:$24 sps:$4 sm:$0xff]   ;;  %v1672_v2 = vld [vmem:[%s2150_s1 + $0x2d8] ss:$24 sps:$4 sm:$0xff]   ;;  %v242_v7 = vld [vmem:[%s1902_s11 + $0x28] sm:$0xff] }
  0x1d   : > { %922 = vmatprep.subr.bf16.mxu1 %v1615_v25  ;;  %v239_v4 = vld [vmem:[%s1902_s11 + $0x10] sm:$0xff]  ;;  %v244_v8 = vld [vmem:[%s1902_s11 + $0x38] sm:$0xff]  ;;  %v241_v13 = vld [vmem:[%s1902_s11 + $0x20] sm:$0xff] }
  0x1e   : > { %v1675_v5 = vld [vmem:[%s2150_s1 + $0x14] ss:$24 sps:$4 sm:$0xff]   ;;  %v1975_v6 = vpack.c.bf16 %v239_v4, %v237_v3  ;;  %v1673_v9 = vld [vmem:[%s2150_s1 + $0x10] ss:$24 sps:$4 sm:$0xff]   ;;  %v1678_v10 = vld [vmem:[%s2150_s1 + $0x44] ss:$24 sps:$4 sm:$0xff]   ;;  %v1985_v11 = vpack.c.bf16 %v244_v8, %v242_v7 }
  0x1f   : > { %850 = vmatpush1.bf16.msra.mxu0 %v1617_v26  ;;  %v1676_v12 = vld [vmem:[%s2150_s1 + $0x40] ss:$24 sps:$4 sm:$0xff]   ;;  %v243_v14 = vld [vmem:[%s1902_s11 + $0x30] sm:$0xff]  ;;  %v246_v17 = vld [vmem:[%s1902_s11 + $0x48] sm:$0xff] }
  0x20   : > { %923 = vmatpush1.bf16.msra.mxu1 %v1618_v27  ;;  %851 = vmatprep.subr.bf16.mxu0 %v1619_v28  ;;  %v1681_v15 = vld [vmem:[%s2150_s1 + $0x74] ss:$24 sps:$4 sm:$0xff]   ;;  %v1999_v16 = vpack.c.bf16 %v243_v14, %v241_v13  ;;  %v248_v18 = vld [vmem:[%s1902_s11 + $0x58] sm:$0xff]  ;;  %v1679_v19 = vld [vmem:[%s2150_s1 + $0x70] ss:$24 sps:$4 sm:$0xff]  }
  0x21   : > { %924 = vmatprep.subr.bf16.mxu1 %v1621_v29  ;;  %v1684_v20 = vld [vmem:[%s2150_s1 + $0xa4] ss:$24 sps:$4 sm:$0xff]   ;;  %v258_v21 = vpack.c.bf16 %v248_v18, %v246_v17  ;;  %v1682_v22 = vld [vmem:[%s2150_s1 + $0xa0] ss:$24 sps:$4 sm:$0xff]   ;;  %v247_v24 = vld [vmem:[%s1902_s11 + $0x50] sm:$0xff] }
  0x22   : > { %v245_v23 = vld [vmem:[%s1902_s11 + $0x40] sm:$0xff]  ;;  %v1687_v25 = vld [vmem:[%s2150_s1 + $0xd4] ss:$24 sps:$4 sm:$0xff]   ;;  %v252_v28 = vld [vmem:[%s1902_s11 + $0x78] sm:$0xff] }
  0x23   : > { %852 = vmatpush1.bf16.msra.mxu0 %v1623_v30  ;;  %v2019_v26 = vpack.c.bf16 %v247_v24, %v245_v23  ;;  %v250_v27 = vld [vmem:[%s1902_s11 + $0x68] sm:$0xff]  ;;  %v1690_v30 = vld [vmem:[%s2150_s1 + $0x104] ss:$24 sps:$4 sm:$0xff]  }
  0x24   : > { %925 = vmatpush1.bf16.msra.mxu1 %v1624_v31  ;;  %853 = vmatprep.subr.bf16.mxu0 %v1625_v32  ;;  %v1685_v29 = vld [vmem:[%s2150_s1 + $0xd0] ss:$24 sps:$4 sm:$0xff]   ;;  %v2029_v31 = vpack.c.bf16 %v252_v28, %v250_v27  ;;  %v1688_v32 = vld [vmem:[%s2150_s1 + $0x100] ss:$24 sps:$4 sm:$0xff]   ;;  %v1708_v46 = vld [vmem:[%s2150_s1 + $0x224] ss:$24 sps:$4 sm:$0xff]  }
  0x25   : > { %926 = vmatprep.subr.bf16.mxu1 %v1627_v33  ;;  %v249_v33 = vld [vmem:[%s1902_s11 + $0x60] sm:$0xff]  ;;  %v1709_v49 = vld [vmem:[%s2150_s1 + $0x250] ss:$24 sps:$4 sm:$0xff]  }
  0x27   : > { %854 = vmatpush1.bf16.msra.mxu0 %v1629_v34  ;;  %v251_v34 = vld [vmem:[%s1902_s11 + $0x70] sm:$0xff] }
  0x28   : > { %927 = vmatpush1.bf16.msra.mxu1 %v1630_v35  ;;  %855 = vmatprep.subr.bf16.mxu0 %v1631_v36  ;;  %v1693_v35 = vld [vmem:[%s2150_s1 + $0x134] ss:$24 sps:$4 sm:$0xff]   ;;  %v2043_v36 = vpack.c.bf16 %v251_v34, %v249_v33 }
  0x29   : > { %928 = vmatprep.subr.bf16.mxu1 %v1633_v37  ;;  %v1691_v37 = vld [vmem:[%s2150_s1 + $0x130] ss:$24 sps:$4 sm:$0xff]  }
  0x2b   : > { %856 = vmatpush1.bf16.msra.mxu0 %v1635_v38  ;;  %v1696_v38 = vld [vmem:[%s2150_s1 + $0x164] ss:$24 sps:$4 sm:$0xff]  }
  0x2c   : > { %929 = vmatpush1.bf16.msra.mxu1 %v1636_v39  ;;  %857 = vmatprep.subr.bf16.mxu0 %v1637_v40  ;;  %v1694_v39 = vld [vmem:[%s2150_s1 + $0x160] ss:$24 sps:$4 sm:$0xff]   ;;  %v1699_v40 = vld [vmem:[%s2150_s1 + $0x194] ss:$24 sps:$4 sm:$0xff]  }
  0x2d   : > { %930 = vmatprep.subr.bf16.mxu1 %v1639_v41  ;;  %v1697_v41 = vld [vmem:[%s2150_s1 + $0x190] ss:$24 sps:$4 sm:$0xff]  }
  0x2f   : > { %858 = vmatpush1.bf16.msra.mxu0 %v1641_v42  ;;  %v1702_v42 = vld [vmem:[%s2150_s1 + $0x1c4] ss:$24 sps:$4 sm:$0xff]  }
  0x30   : > { %931 = vmatpush1.bf16.msra.mxu1 %v1642_v43  ;;  %859 = vmatprep.subr.bf16.mxu0 %v1643_v44  ;;  %v1700_v43 = vld [vmem:[%s2150_s1 + $0x1c0] ss:$24 sps:$4 sm:$0xff]   ;;  %v1705_v44 = vld [vmem:[%s2150_s1 + $0x1f4] ss:$24 sps:$4 sm:$0xff]  }
  0x31   : > { %932 = vmatprep.subr.bf16.mxu1 %v1645_v45  ;;  %v1703_v45 = vld [vmem:[%s2150_s1 + $0x1f0] ss:$24 sps:$4 sm:$0xff]  }
  0x33   : > { %860 = vmatpush1.bf16.msra.mxu0 %v1647_v47  ;;  %v1706_v47 = vld [vmem:[%s2150_s1 + $0x220] ss:$24 sps:$4 sm:$0xff]  }
  0x34   : > { %933 = vmatpush1.bf16.msra.mxu1 %v1648_v48  ;;  %861 = vmatprep.subr.bf16.mxu0 %v1649_v50  ;;  %v1711_v48 = vld [vmem:[%s2150_s1 + $0x254] ss:$24 sps:$4 sm:$0xff]   ;;  %v1714_v50 = vld [vmem:[%s2150_s1 + $0x284] ss:$24 sps:$4 sm:$0xff]  }
  0x35   : > { %934 = vmatprep.subr.bf16.mxu1 %v1651_v52  ;;  %v1717_v52 = vld [vmem:[%s2150_s1 + $0x2b4] ss:$24 sps:$4 sm:$0xff]  }
  0x37   : > { %862 = vmatpush1.bf16.msra.mxu0 %v1653_v53  ;;  %v1715_v53 = vld [vmem:[%s2150_s1 + $0x2b0] ss:$24 sps:$4 sm:$0xff]  }
  0x38   : > { %935 = vmatpush1.bf16.msra.mxu1 %v1654_v54  ;;  %863 = vmatprep.subr.bf16.mxu0 %v1655_v55  ;;  %v1720_v54 = vld [vmem:[%s2150_s1 + $0x2e4] ss:$24 sps:$4 sm:$0xff]   ;;  %v1718_v55 = vld [vmem:[%s2150_s1 + $0x2e0] ss:$24 sps:$4 sm:$0xff]  }
  0x39   : > { %936 = vmatprep.subr.bf16.mxu1 %v1657_v56 }
  0x3b   : > { %864 = vmatpush1.bf16.msra.mxu0 %v1659_v57 }
  0x3c   : > { %937 = vmatpush1.bf16.msra.mxu1 %v1660_v58  ;;  %865 = vmatprep.subr.bf16.mxu0 %v1661_v59 }
  0x3d   : > { %938 = vmatprep.subr.bf16.mxu1 %v1663_v60 }
  0x3f   : > { %866 = vmatpush1.bf16.msra.mxu0 %v1665_v61 }
  0x40   : > { %939 = vmatpush1.bf16.msra.mxu1 %v1666_v62  ;;  %867 = vmatprep.subr.bf16.mxu0 %v1667_v63 }
  0x41   : > { %940 = vmatprep.subr.bf16.mxu1 %v1669_v0 }
  0x43   : > { %868 = vmatpush1.bf16.msra.mxu0 %v1671_v1 }
  0x44   : > { %941 = vmatpush1.bf16.msra.mxu1 %v1672_v2  ;;  %983 = vmatprep.subr.bf16.mxu0 %v1675_v5 }
  0x45   : > { %1537 = vmatprep.subr.bf16.mxu1 %v1675_v5 }
  0x46   : > { %870 = vmatmul.mubr.bf16.vlgmr.msra.gmra.mrb[0].mxu0 %v1975_v6 }
  0x47   : > { %943 = vmatmul.mubr.bf16.vlgmr.msra.gmra.mrb[0].mxu1 %v1975_v6  ;;  %984 = vmatpush1.bf16.msra.mxu0 %v1673_v9 }
  0x48   : > { %1553 = vmatpush1.bf16.msra.mxu1 %v1673_v9  ;;  %985 = vmatprep.subr.bf16.mxu0 %v1678_v10 }
  0x49   : > { %1538 = vmatprep.subr.bf16.mxu1 %v1678_v10  ;;  %879 = vmatprep.mubr.bf16.mxu0 %v1985_v11 }
  0x4a   : > { %952 = vmatprep.mubr.bf16.mxu1 %v1985_v11 }
  0x4b   : > { %986 = vmatpush1.bf16.msra.mxu0 %v1676_v12 }
  0x4c   : > { %1554 = vmatpush1.bf16.msra.mxu1 %v1676_v12  ;;  %987 = vmatprep.subr.bf16.mxu0 %v1681_v15 }
  0x4d   : > { %1539 = vmatprep.subr.bf16.mxu1 %v1681_v15 }
  0x4e   : > { %880 = vmatmul.mubr.bf16.gmra.mrb[4].mxu0 %v1999_v16 }
  0x4f   : > { %953 = vmatmul.mubr.bf16.gmra.mrb[4].mxu1 %v1999_v16  ;;  %988 = vmatpush1.bf16.msra.mxu0 %v1679_v19 }
  0x50   : > { %1555 = vmatpush1.bf16.msra.mxu1 %v1679_v19  ;;  %989 = vmatprep.subr.bf16.mxu0 %v1684_v20 }
  0x51   : > { %1540 = vmatprep.subr.bf16.mxu1 %v1684_v20  ;;  %889 = vmatprep.mubr.bf16.mxu0 %v258_v21 }
  0x52   : > { %962 = vmatprep.mubr.bf16.mxu1 %v258_v21 }
  0x53   : > { %990 = vmatpush1.bf16.msra.mxu0 %v1682_v22 }
  0x54   : > { %1556 = vmatpush1.bf16.msra.mxu1 %v1682_v22  ;;  %991 = vmatprep.subr.bf16.mxu0 %v1687_v25 }
  0x55   : > { %1541 = vmatprep.subr.bf16.mxu1 %v1687_v25 }
  0x56   : > { %890 = vmatmul.mubr.bf16.gmra.mrb[8].mxu0 %v2019_v26 }
  0x57   : > { %963 = vmatmul.mubr.bf16.gmra.mrb[8].mxu1 %v2019_v26  ;;  %992 = vmatpush1.bf16.msra.mxu0 %v1685_v29 }
  0x58   : > { %1557 = vmatpush1.bf16.msra.mxu1 %v1685_v29  ;;  %993 = vmatprep.subr.bf16.mxu0 %v1690_v30 }
  0x59   : > { %1542 = vmatprep.subr.bf16.mxu1 %v1690_v30  ;;  %899 = vmatprep.mubr.bf16.mxu0 %v2029_v31 }
  0x5a   : > { %972 = vmatprep.mubr.bf16.mxu1 %v2029_v31 }
  0x5b   : > { %994 = vmatpush1.bf16.msra.mxu0 %v1688_v32 }
  0x5c   : > { %1558 = vmatpush1.bf16.msra.mxu1 %v1688_v32  ;;  %995 = vmatprep.subr.bf16.mxu0 %v1693_v35 }
  0x5d   : > { %1543 = vmatprep.subr.bf16.mxu1 %v1693_v35 }
  0x5e   : > { %900 = vmatmul.mubr.bf16.gmra.mrb[12].mxu0 %v2043_v36 }
  0x5f   : > { %973 = vmatmul.mubr.bf16.gmra.mrb[12].mxu1 %v2043_v36  ;;  %996 = vmatpush1.bf16.msra.mxu0 %v1691_v37 }
  0x60   : > { %1559 = vmatpush1.bf16.msra.mxu1 %v1691_v37  ;;  %997 = vmatprep.subr.bf16.mxu0 %v1696_v38 }
  0x61   : > { %1544 = vmatprep.subr.bf16.mxu1 %v1696_v38  ;;  %1015 = vmatprep.mubr.bf16.mxu0 %v1921_v51  ;;  %v1712_v51 = vld [vmem:[%s2150_s1 + $0x280] ss:$24 sps:$4 sm:$0xff]  }
  0x62   : > { %1035 = vmatprep.mubr.bf16.mxu1 %v258_v21 }
  0x63   : > { %998 = vmatpush1.bf16.msra.mxu0 %v1694_v39 }
  0x64   : > { %1560 = vmatpush1.bf16.msra.mxu1 %v1694_v39  ;;  %999 = vmatprep.subr.bf16.mxu0 %v1699_v40 }
  0x65   : > { %1545 = vmatprep.subr.bf16.mxu1 %v1699_v40 }
  0x67   : > { %1000 = vmatpush1.bf16.msra.mxu0 %v1697_v41 }
  0x68   : > { %1561 = vmatpush1.bf16.msra.mxu1 %v1697_v41  ;;  %1001 = vmatprep.subr.bf16.mxu0 %v1702_v42 }
  0x69   : > { %1546 = vmatprep.subr.bf16.mxu1 %v1702_v42 }
  0x6b   : > { %1002 = vmatpush1.bf16.msra.mxu0 %v1700_v43 }
  0x6c   : > { %1562 = vmatpush1.bf16.msra.mxu1 %v1700_v43  ;;  %1003 = vmatprep.subr.bf16.mxu0 %v1705_v44 }
  0x6d   : > { %1547 = vmatprep.subr.bf16.mxu1 %v1705_v44 }
  0x6f   : > { %1004 = vmatpush1.bf16.msra.mxu0 %v1703_v45 }
  0x70   : > { %1563 = vmatpush1.bf16.msra.mxu1 %v1703_v45  ;;  %1005 = vmatprep.subr.bf16.mxu0 %v1708_v46 }
  0x71   : > { %1548 = vmatprep.subr.bf16.mxu1 %v1708_v46 }
  0x73   : > { %1006 = vmatpush1.bf16.msra.mxu0 %v1706_v47 }
  0x74   : > { %1564 = vmatpush1.bf16.msra.mxu1 %v1706_v47  ;;  %1007 = vmatprep.subr.bf16.mxu0 %v1711_v48 }
  0x75   : > { %1549 = vmatprep.subr.bf16.mxu1 %v1711_v48 }
  0x77   : > { %1008 = vmatpush1.bf16.msra.mxu0 %v1709_v49 }
  0x78   : > { %1565 = vmatpush1.bf16.msra.mxu1 %v1709_v49  ;;  %1009 = vmatprep.subr.bf16.mxu0 %v1714_v50 }
  0x79   : > { %1550 = vmatprep.subr.bf16.mxu1 %v1714_v50 }
  0x7b   : > { %1010 = vmatpush1.bf16.msra.mxu0 %v1712_v51 }
  0x7c   : > { %1566 = vmatpush1.bf16.msra.mxu1 %v1712_v51  ;;  %1011 = vmatprep.subr.bf16.mxu0 %v1717_v52 }
  0x7d   : > { %1551 = vmatprep.subr.bf16.mxu1 %v1717_v52 }
  0x7f   : > { %1012 = vmatpush1.bf16.msra.mxu0 %v1715_v53 }
  0x80   : > { %1567 = vmatpush1.bf16.msra.mxu1 %v1715_v53  ;;  %1013 = vmatprep.subr.bf16.mxu0 %v1720_v54 }
  0x81   : > { %1552 = vmatprep.subr.bf16.mxu1 %v1720_v54 }
  0x83   : > { %1014 = vmatpush1.bf16.msra.mxu0 %v1718_v55 }
  0x84   : > { %1568 = vmatpush1.bf16.msra.mxu1 %v1718_v55 }
  0x86   : > { %1016 = vmatmul.mubr.bf16.vlgmr.msra.gmra.mrb[16].mxu0 %v1975_v6 }
  0x87   : > { %1036 = vmatmul.mubr.bf16.vlgmr.msra.gmra.mrb[16].mxu1 %v2019_v26  ;;  %1025 = vmatprep.mubr.bf16.mxu0 %v1985_v11 }
  0x88   : > { %1045 = vmatprep.mubr.bf16.mxu1 %v2029_v31 }
  0x8e   : > { %1026 = vmatmul.mubr.bf16.gmra.mrb[20].mxu0 %v1999_v16 }
  0x8f   : > { %1046 = vmatmul.mubr.bf16.gmra.mrb[20].mxu1 %v2043_v36 }
 0x119   : > { %v871_v56 = vpop.f32.mrb[0].mxu0 }
 0x11a   : > { %v944_v57 = vpop.f32.mrb[0].mxu1  ;;  %v1056_v58 = vmul.f32 0.125, %v871_v56  ;;  %v873_v59 = vpop.f32.mrb[1].mxu0 }
 0x11b   : > { %v946_v60 = vpop.f32.mrb[1].mxu1  ;;  %v1057_v61 = vmul.f32 0.125, %v873_v59  ;;  %v875_v63 = vpop.f32.mrb[2].mxu0 }
 0x11c   : > { %v1521_v62 = vpack.c.bf16 %v946_v60, %v944_v57  ;;  %v948_v0 = vpop.f32.mrb[2].mxu1  ;;  %v1058_v1 = vmul.f32 0.125, %v875_v63  ;;  %v877_v2 = vpop.f32.mrb[3].mxu0 }
 0x11d   : > { %v950_v3 = vpop.f32.mrb[3].mxu1  ;;  %v1513_v4 = vpack.c.bf16 %v1057_v61, %v1056_v58  ;;  %v1059_v5 = vmul.f32 0.125, %v877_v2 }
 0x11e   : > { %1176 = vst [vmem:[%s2118_s26] sm:$0xff] %v1521_v62  ;;  %v1522_v6 = vpack.c.bf16 %v950_v3, %v948_v0 }
 0x11f   : > { %1120 = vst [vmem:[%s2124_s28] sm:$0xff] %v1513_v4  ;;  %v1514_v7 = vpack.c.bf16 %v1059_v5, %v1058_v1 }
 0x120   : > { %1177 = vst [vmem:[%s2118_s26 + $0x8] sm:$0xff] %v1522_v6 }
 0x121   : > { %1121 = vst [vmem:[%s2124_s28 + $0x8] sm:$0xff] %v1514_v7  ;;  %v881_v8 = vpop.f32.mrb[4].mxu0 }
 0x122   : > { %v954_v9 = vpop.f32.mrb[4].mxu1  ;;  %v1060_v10 = vmul.f32 0.125, %v881_v8  ;;  %v883_v11 = vpop.f32.mrb[5].mxu0 }
 0x123   : > { %v956_v12 = vpop.f32.mrb[5].mxu1  ;;  %v1061_v13 = vmul.f32 0.125, %v883_v11  ;;  %v885_v15 = vpop.f32.mrb[6].mxu0 }
 0x124   : > { %v1523_v14 = vpack.c.bf16 %v956_v12, %v954_v9  ;;  %v958_v16 = vpop.f32.mrb[6].mxu1  ;;  %v1062_v17 = vmul.f32 0.125, %v885_v15  ;;  %v887_v18 = vpop.f32.mrb[7].mxu0 }
 0x125   : > { %v960_v19 = vpop.f32.mrb[7].mxu1  ;;  %v1515_v20 = vpack.c.bf16 %v1061_v13, %v1060_v10  ;;  %v1063_v21 = vmul.f32 0.125, %v887_v18 }
 0x126   : > { %1178 = vst [vmem:[%s2118_s26 + $0x10] sm:$0xff] %v1523_v14  ;;  %v1524_v22 = vpack.c.bf16 %v960_v19, %v958_v16 }
 0x127   : > { %1122 = vst [vmem:[%s2124_s28 + $0x10] sm:$0xff] %v1515_v20  ;;  %v1516_v23 = vpack.c.bf16 %v1063_v21, %v1062_v17 }
 0x128   : > { %1179 = vst [vmem:[%s2118_s26 + $0x18] sm:$0xff] %v1524_v22 }
 0x129   : > { %1123 = vst [vmem:[%s2124_s28 + $0x18] sm:$0xff] %v1516_v23  ;;  %v891_v24 = vpop.f32.mrb[8].mxu0 }
 0x12a   : > { %v964_v25 = vpop.f32.mrb[8].mxu1  ;;  %v1064_v26 = vmul.f32 0.125, %v891_v24  ;;  %v893_v27 = vpop.f32.mrb[9].mxu0 }
 0x12b   : > { %v966_v28 = vpop.f32.mrb[9].mxu1  ;;  %v1065_v29 = vmul.f32 0.125, %v893_v27  ;;  %v895_v31 = vpop.f32.mrb[10].mxu0 }
 0x12c   : > { %v1525_v30 = vpack.c.bf16 %v966_v28, %v964_v25  ;;  %v968_v32 = vpop.f32.mrb[10].mxu1  ;;  %v1066_v33 = vmul.f32 0.125, %v895_v31  ;;  %v897_v34 = vpop.f32.mrb[11].mxu0 }
 0x12d   : > { %v970_v35 = vpop.f32.mrb[11].mxu1  ;;  %v1517_v36 = vpack.c.bf16 %v1065_v29, %v1064_v26  ;;  %v1067_v37 = vmul.f32 0.125, %v897_v34 }
 0x12e   : > { %1180 = vst [vmem:[%s2118_s26 + $0x20] sm:$0xff] %v1525_v30  ;;  %v1526_v38 = vpack.c.bf16 %v970_v35, %v968_v32 }
 0x12f   : > { %1124 = vst [vmem:[%s2124_s28 + $0x20] sm:$0xff] %v1517_v36  ;;  %v1518_v39 = vpack.c.bf16 %v1067_v37, %v1066_v33 }
 0x130   : > { %1181 = vst [vmem:[%s2118_s26 + $0x28] sm:$0xff] %v1526_v38 }
 0x131   : > { %1125 = vst [vmem:[%s2124_s28 + $0x28] sm:$0xff] %v1518_v39  ;;  %v901_v40 = vpop.f32.mrb[12].mxu0 }
 0x132   : > { %v974_v41 = vpop.f32.mrb[12].mxu1  ;;  %v1068_v42 = vmul.f32 0.125, %v901_v40  ;;  %v903_v43 = vpop.f32.mrb[13].mxu0 }
 0x133   : > { %v976_v44 = vpop.f32.mrb[13].mxu1  ;;  %v1069_v45 = vmul.f32 0.125, %v903_v43  ;;  %v905_v47 = vpop.f32.mrb[14].mxu0 }
 0x134   : > { %v1527_v46 = vpack.c.bf16 %v976_v44, %v974_v41  ;;  %v978_v48 = vpop.f32.mrb[14].mxu1  ;;  %v1070_v49 = vmul.f32 0.125, %v905_v47  ;;  %v907_v50 = vpop.f32.mrb[15].mxu0 }
 0x135   : > { %v980_v51 = vpop.f32.mrb[15].mxu1  ;;  %v1519_v52 = vpack.c.bf16 %v1069_v45, %v1068_v42  ;;  %v1071_v53 = vmul.f32 0.125, %v907_v50 }
 0x136   : > { %1182 = vst [vmem:[%s2118_s26 + $0x30] sm:$0xff] %v1527_v46  ;;  %v1528_v54 = vpack.c.bf16 %v980_v51, %v978_v48 }
 0x137   : > { %1126 = vst [vmem:[%s2124_s28 + $0x30] sm:$0xff] %v1519_v52  ;;  %v1520_v55 = vpack.c.bf16 %v1071_v53, %v1070_v49 }
 0x138   : > { %1183 = vst [vmem:[%s2118_s26 + $0x38] sm:$0xff] %v1528_v54 }
 0x139   : > { %1127 = vst [vmem:[%s2124_s28 + $0x38] sm:$0xff] %v1520_v55 }
 0x159   : > { %v1017_v56 = vpop.f32.mrb[16].mxu0 }
 0x15a   : > { %v1037_v57 = vpop.f32.mrb[16].mxu1  ;;  %v1019_v58 = vpop.f32.mrb[17].mxu0 }
 0x15b   : > { %v1039_v59 = vpop.f32.mrb[17].mxu1  ;;  %v1529_v60 = vpack.c.bf16 %v1019_v58, %v1017_v56  ;;  %v1021_v62 = vpop.f32.mrb[18].mxu0 }
 0x15c   : > { %v1533_v61 = vpack.c.bf16 %v1039_v59, %v1037_v57  ;;  %v1041_v63 = vpop.f32.mrb[18].mxu1  ;;  %v1023_v0 = vpop.f32.mrb[19].mxu0 }
 0x15d   : > { %v1043_v1 = vpop.f32.mrb[19].mxu1  ;;  %1232 = vst [vmem:[%s235_s6] sm:$0xff] %v1529_v60  ;;  %v1530_v2 = vpack.c.bf16 %v1023_v0, %v1021_v62 }
 0x15e   : > { %1236 = vst [vmem:[%s235_s6 + $0x20] sm:$0xff] %v1533_v61  ;;  %v1534_v3 = vpack.c.bf16 %v1043_v1, %v1041_v63 }
 0x15f   : > { %1233 = vst [vmem:[%s235_s6 + $0x8] sm:$0xff] %v1530_v2 }
 0x160   : > { %1237 = vst [vmem:[%s235_s6 + $0x28] sm:$0xff] %v1534_v3 }
 0x161   : > { %v1027_v4 = vpop.f32.mrb[20].mxu0 }
 0x162   : > { %v1047_v5 = vpop.f32.mrb[20].mxu1  ;;  %v1029_v6 = vpop.f32.mrb[21].mxu0 }
 0x163   : > { %v1049_v7 = vpop.f32.mrb[21].mxu1  ;;  %v1531_v8 = vpack.c.bf16 %v1029_v6, %v1027_v4  ;;  %v1031_v10 = vpop.f32.mrb[22].mxu0 }
 0x164   : > { %v1535_v9 = vpack.c.bf16 %v1049_v7, %v1047_v5  ;;  %v1051_v11 = vpop.f32.mrb[22].mxu1  ;;  %v1033_v12 = vpop.f32.mrb[23].mxu0 }
 0x165   : > { %v1053_v13 = vpop.f32.mrb[23].mxu1  ;;  %1234 = vst [vmem:[%s235_s6 + $0x10] sm:$0xff] %v1531_v8  ;;  %v1532_v14 = vpack.c.bf16 %v1033_v12, %v1031_v10 }
 0x166   : > { %1238 = vst [vmem:[%s235_s6 + $0x30] sm:$0xff] %v1535_v9  ;;  %v1536_v15 = vpack.c.bf16 %v1053_v13, %v1051_v11 }
 0x167   : > { %1235 = vst [vmem:[%s235_s6 + $0x18] sm:$0xff] %v1532_v14 }
 0x168   : > { %1239 = vst [vmem:[%s235_s6 + $0x38] sm:$0xff] %v1536_v15 }
 0x169 PF: > { %s15_s15 = sadd.s32 1, %s1727_s15  }
 0x16a   : > { %p12_p4 = scmp.ge.s32.totalorder %s15_s15, 6  }
 0x16c   :  { %14 = sbr.rel (!%p12_p4) target bundleno = 1 (0x1), region = 82 }

// kernel: attention_forward.3
= control target key start
LH: loop header
LB: loop body
LE: loop exit
PB: predicated region body
PF: predicated region fallthrough
CT: control target
= control target key end

     0   :  { %10 = vsyncpa [#allocation4], 0  ;;  %s3424_s0 = inlined_call_operand.vmem [shape: bf16[2,128,256], index: 0, kind: input, shape index: {}]   ;;  %s3425_s1 = inlined_call_operand.vmem [shape: bf16[2,128,256], index: 1, kind: input, shape index: {}]   ;;  %s3426_s2 = inlined_call_operand.vmem [shape: bf16[2,128,256], index: 2, kind: input, shape index: {}]   ;;  %s3427_s3 = inlined_call_operand.vmem [shape: bf16[256,256], index: 3, kind: input, shape index: {}]   ;;  %s3428_s4 = inlined_call_operand.vmem [shape: f32[1,256], index: 4, kind: input, shape index: {}]   ;;  %s3429_s5 = inlined_call_operand.hbm [shape: f32[2,128,256], index: 5, kind: output, shape index: {}]  }
   0x1   :  { %12 = vsyncpa [#allocation4 + $0x1], 0  ;;  %s2597_s18 = smov 0   ;;  %s2599_s19 = smov 0  }
   0x2   :  { %s2601_s20 = smov 0   ;;  %s2603_s21 = smov 0  }
   0x3   :  { %s2605_s22 = smov 0   ;;  %s2607_s23 = smov 0  }
   0x4   :  { %s2609_s24 = smov 0   ;;  %s2611_s25 = smov 0  }
   0x5 LB: > { %s1855_s26 = sadd.s32 4294967295, %s2561_s25   ;;  %s1856_s27 = sadd.s32 4294967294, %s2561_s25   ;;  %s2561_s25 = sphi %s2611_s25, %s18_s25   ;;  %s2557_s24 = sphi %s2609_s24, %s3438_s24   ;;  %s2553_s23 = sphi %s2607_s23, %s3437_s23   ;;  %s2549_s22 = sphi %s2605_s22, %s3436_s22   ;;  %s2545_s21 = sphi %s2603_s21, %s3435_s21   ;;  %s2541_s20 = sphi %s2601_s20, %s3434_s20   ;;  %s2537_s19 = sphi %s2599_s19, %s3433_s19   ;;  %s2533_s18 = sphi %s2597_s18, %s3432_s18  }
   0x6   : > { %s27_s28 = sadd.s32 1, %s2553_s23  ;;  %s30_s29 = sadd.s32 1, %s2557_s24 }
   0x7   : > { %p28_p0 = scmp.ge.s32.totalorder %s27_s28, 4  ;;  %p171_p1 = scmp.ne.s32.totalorder %s2541_s20, %s2537_s19 }
   0x8   : > { %p172_p2 = scmp.eq.s32.totalorder %s1855_s26, 7  ;;  %p177_p5 = scmp.ne.s32.totalorder %s2537_s19, %s2533_s18 }
   0x9   : > { %s3440_s28 = smov (%p28_p0, %s27_s28), 0  ;;  %s3442_s29 = smov (!%p28_p0, %s30_s29), %s2557_s24 }
   0xa   : > { %s157_s30 = ssub.s32 %s2553_s23, %s3440_s28  ;;  %p2648_p3 = por %p172_p2, %p171_p1 }
   0xb   : > { %p32_p4 = scmp.ge.s32.totalorder %s3442_s29, 2  ;;  %p178_p6 = scmp.eq.s32.totalorder %s1856_s27, 7 }
   0xc   : > { %p1859_p7 = scmp.ge.s32.totalorder %s2561_s25, 1  ;;  %p232_p9 = scmp.lt.s32.totalorder %s2561_s25, 9 }
   0xd   : > { %s3444_s29 = smov (%p32_p4, %s3442_s29), 0  ;;  %p2657_p8 = por %p178_p6, %p177_p5 }
   0xe   : > { %s156_s8 = ssub.s32 %s2557_s24, %s3444_s29  ;;  %s161_s9 = sadd.s32 1, %s2541_s20 }
   0xf   : > { %s158_s10 = sor.u32 %s157_s30, %s156_s8  ;;  %p233_p10 = pnand %p1859_p7, %p232_p9 }
  0x10   : > { %p159_p11 = scmp.eq.s32.totalorder %s158_s10, 0  ;;  %p276_p12 = scmp.lt.s32.totalorder (!%p233_p10), %s2549_s22, 1  ;;  %vm544_vm0 = vcmask (!%p233_p10), 523264   ;;  %vm1441_vm1 = vcmask (!%p233_p10), 1048064  }
  0x11   : > { %236 = sbr.rel (%p233_p10) target bundleno = 1241 (0x4d9), region = 40  ;;  %s1861_s12 = sshll.u32 (!%p233_p10), %s2545_s21, 2 }
  0x12   : > { %s2666_s11 = scalar_select %p159_p11, %s2541_s20, %s161_s9  }
  0x13   : > { %p278_p13 = scmp.lt.s32.totalorder (!%p233_p10), %s1861_s12, 15  ;;  %s2563_s27 = smov (!%p233_p10), 64  }
  0x18   : > { %s2671_s13 = scalar_select %p276_p12, %s2549_s22, 1 }
  0x19   : > { %s3446_s12 = smov (!%p278_p13, %s1861_s12), 15 }
  0x1a   : > { %s1988_s14 = sshll.u32 %s2671_s13, 7  ;;  %s1863_s26 = sshll.u32 %s2671_s13, 5 }
  0x1b   : > { %s2679_s17 = scalar_lea.vmem %s3425_s1, %s1988_s14  ;;  %s1862_s30 = sshll.u32 %s3446_s12, 1 }
  0x1c   : > { %v2683_v0 = vld [vmem:[%s2679_s17] sm:$0xff]  ;;  %v2686_v1 = vld [vmem:[%s2679_s17 + $0x8] sm:$0xff]  ;;  %v2689_v2 = vld [vmem:[%s2679_s17 + $0x10] sm:$0xff]  ;;  %s282_s8 = sadd.s32 %s1863_s26, %s1862_s30  ;;  %s2849_s26 = scalar_lea.vmem %s3426_s2, %s1988_s14 }
  0x1d   : > { %370 = vrot.lane.b32.xlu0 %v2683_v0, %s2563_s27  ;;  %v1871_v3 = vcombine.low %v2683_v0, %v2686_v1  ;;  %374 = vrot.lane.b32.xlu1 %v2689_v2, %s2563_s27  ;;  %v2698_v4 = vld [vmem:[%s2679_s17 + $0x18] sm:$0xff]  ;;  %s1864_s9 = sshll.u32 %s282_s8, 2  ;;  %v2709_v7 = vld [vmem:[%s2679_s17 + $0x20] sm:$0xff]  ;;  %v354_v36 = vrot.slane %v2683_v0, 4  ;;  %v355_v37 = vrot.slane %v2686_v1, 4  ;;  %v356_v42 = vrot.slane %v2689_v2, 4 }
  0x1e   : > { %v1872_v5 = vcombine.low %v2689_v2, %v2698_v4  ;;  %s2714_s12 = scalar_lea.vmem %s3424_s0, %s1864_s9  ;;  %v2718_v8 = vld [vmem:[%s2679_s17 + $0x28] sm:$0xff]  ;;  %v2737_v14 = vld [vmem:[%s2679_s17 + $0x38] sm:$0xff]  ;;  %v2741_v15 = vld [vmem:[%s2679_s17 + $0x30] sm:$0xff]  ;;  %v357_v43 = vrot.slane %v2698_v4, 4  ;;  %v358_v49 = vrot.slane %v2709_v7, 4  ;;  %s1990_s14 = sshll.u32 %s2545_s21, 3 }
  0x1f   : > { %2231 = vmatprep.subr.msk.bf16.mxu0 %vm544_vm0, %v1871_v3  ;;  %v552_v6 = vsel %vm544_vm0, %v1871_v3, 0  ;;  %v2721_v9 = vld [vmem:[%s2714_s12 + $0x8] sm:$0xff]  ;;  %v2724_v10 = vld [vmem:[%s2714_s12] sm:$0xff]  ;;  %v1873_v13 = vcombine.low %v2709_v7, %v2718_v8  ;;  %v1874_v18 = vcombine.low %v2741_v15, %v2737_v14  ;;  %v2761_v20 = vld [vmem:[%s2679_s17 + $0x58] sm:$0xff]  ;;  %v1895_v41 = vcombine.low %v354_v36, %v355_v37  ;;  %s1984_s30 = sshll.u32 %s2549_s22, 5 }
  0x20   : > { %2072 = vmatpush3.bf16.xpose.msra.mxu0 %v552_v6  ;;  %v1869_v11 = vcombine.low %v2724_v10, %v2721_v9  ;;  %v555_v12 = vsel %vm544_vm0, %v1872_v5, 0  ;;  %v2748_v16 = vld [vmem:[%s2679_s17 + $0x48] sm:$0xff]  ;;  %v2754_v19 = vld [vmem:[%s2679_s17 + $0x40] sm:$0xff]  ;;  %v2765_v21 = vld [vmem:[%s2679_s17 + $0x50] sm:$0xff]  ;;  %v307_v39 = vrot.slane %v2721_v9, 4  ;;  %v306_v40 = vrot.slane %v2724_v10, 4  ;;  %s1743_s9 = sadd.s32 %s1990_s14, %s1984_s30 }
  0x21   : > { %372 = vrot.lane.b32.xlu0 %v2686_v1, %s2563_s27  ;;  %376 = vrot.lane.b32.xlu1 %v2698_v4, %s2563_s27  ;;  %v558_v17 = vsel %vm544_vm0, %v1873_v13, 0  ;;  %v2772_v22 = vld [vmem:[%s2679_s17 + $0x68] sm:$0xff]  ;;  %v561_v23 = vsel %vm544_vm0, %v1874_v18, 0  ;;  %v1875_v24 = vcombine.low %v2754_v19, %v2748_v16  ;;  %v2778_v25 = vld [vmem:[%s2679_s17 + $0x60] sm:$0xff]  ;;  %v1876_v29 = vcombine.low %v2765_v21, %v2761_v20  ;;  %s1985_s10 = sshll.u32 %s1743_s9, 7 }
  0x22   : > { %2232 = vmatprep.subr.msk.bf16.mxu0 %vm544_vm0, %v1872_v5  ;;  %2087 = vmatprep.mubr.msk.bf16.mxu0 %vm544_vm0, %v1869_v11  ;;  %v2785_v26 = vld [vmem:[%s2679_s17 + $0x78] sm:$0xff]  ;;  %v2789_v27 = vld [vmem:[%s2679_s17 + $0x70] sm:$0xff]  ;;  %v1877_v33 = vcombine.low %v2778_v25, %v2772_v22  ;;  %v1893_v45 = vcombine.low %v306_v40, %v307_v39  ;;  %v1896_v46 = vcombine.low %v356_v42, %v357_v43  ;;  %v770_v47 = vsel %vm544_vm0, %v1895_v41, 0  ;;  %v2854_v59 = vld [vmem:[%s2849_s26] sm:$0xff] }
  0x23   : > { %v564_v28 = vsel %vm544_vm0, %v1875_v24, 0  ;;  %v2803_v30 = vld [vmem:[%s2714_s12 + $0x18] sm:$0xff]  ;;  %v2807_v31 = vld [vmem:[%s2714_s12 + $0x10] sm:$0xff]  ;;  %v567_v32 = vsel %vm544_vm0, %v1876_v29, 0  ;;  %v1878_v35 = vcombine.low %v2789_v27, %v2785_v26  ;;  %v359_v50 = vrot.slane %v2718_v8, 4  ;;  %v2866_v63 = vld [vmem:[%s2849_s26 + $0x8] sm:$0xff]  ;;  %s3366_s12 = scalar_lea.hbm %s3429_s5, %s1985_s10 }
  0x24   : > { %v570_v34 = vsel %vm544_vm0, %v1877_v33, 0  ;;  %v1870_v44 = vcombine.low %v2807_v31, %v2803_v30  ;;  %v773_v48 = vsel %vm544_vm0, %v1896_v46, 0  ;;  %v360_v53 = vrot.slane %v2741_v15, 4  ;;  %v2859_v61 = vld [vmem:[%s2849_s26 + $0x10] sm:$0xff]  ;;  %v2871_v0 = vld [vmem:[%s2849_s26 + $0x20] sm:$0xff]  ;;  %v2876_v3 = vld [vmem:[%s2849_s26 + $0x18] sm:$0xff] }
  0x25   : > { %380 = vrot.lane.b32.xlu1 %v2718_v8, %s2563_s27  ;;  %378 = vrot.lane.b32.xlu0 %v2709_v7, %s2563_s27  ;;  %v573_v38 = vsel %vm544_vm0, %v1878_v35, 0  ;;  %v1897_v51 = vcombine.low %v358_v49, %v359_v50  ;;  %v361_v54 = vrot.slane %v2737_v14, 4  ;;  %v362_v57 = vrot.slane %v2754_v19, 4  ;;  %v2881_v5 = vld [vmem:[%s2849_s26 + $0x30] sm:$0xff]  ;;  %v2890_v7 = vld [vmem:[%s2849_s26 + $0x28] sm:$0xff] }
  0x26   : > { %v363_v58 = vrot.slane %v2748_v16, 4  ;;  %v364_v1 = vrot.slane %v2765_v21, 4  ;;  %v365_v2 = vrot.slane %v2761_v20, 4  ;;  %v2895_v8 = vld [vmem:[%s2849_s26 + $0x38] sm:$0xff]  ;;  %v2900_v11 = vld [vmem:[%s2849_s26 + $0x40] sm:$0xff] }
  0x27   : > { %v776_v52 = vsel %vm544_vm0, %v1897_v51, 0  ;;  %v1898_v55 = vcombine.low %v360_v53, %v361_v54 }
  0x28   : > { %2074 = vmatpush3.bf16.xpose.msra.mxu0 %v555_v12  ;;  %v1899_v60 = vcombine.low %v362_v57, %v363_v58  ;;  %v1900_v4 = vcombine.low %v364_v1, %v365_v2 }
  0x29   : > { %2233 = vmatprep.subr.msk.bf16.mxu0 %vm544_vm0, %v1873_v13  ;;  %384 = vrot.lane.b32.xlu1 %v2737_v14, %s2563_s27  ;;  %v779_v56 = vsel %vm544_vm0, %v1898_v55, 0  ;;  %v2905_v13 = vld [vmem:[%s2849_s26 + $0x48] sm:$0xff] }
  0x2a   : > { %382 = vrot.lane.b32.xlu0 %v2741_v15, %s2563_s27  ;;  %v782_v62 = vsel %vm544_vm0, %v1899_v60, 0  ;;  %v785_v6 = vsel %vm544_vm0, %v1900_v4, 0 }
  0x2d   : > { %388 = vrot.lane.b32.xlu1 %v2748_v16, %s2563_s27 }
  0x2e   : > { %386 = vrot.lane.b32.xlu0 %v2754_v19, %s2563_s27  ;;  %v368_v19 = vrot.slane %v2789_v27, 4 }
  0x30   : > { %2076 = vmatpush3.bf16.xpose.msra.mxu0 %v558_v17  ;;  %v2918_v17 = vld [vmem:[%s2849_s26 + $0x50] sm:$0xff] }
  0x31   : > { %2234 = vmatprep.subr.msk.bf16.mxu0 %vm544_vm0, %v1874_v18  ;;  %392 = vrot.lane.b32.xlu1 %v2761_v20, %s2563_s27  ;;  %v2921_v18 = vld [vmem:[%s2849_s26 + $0x58] sm:$0xff]  ;;  %v369_v20 = vrot.slane %v2785_v26, 4 }
  0x32   : > { %390 = vrot.lane.b32.xlu0 %v2765_v21, %s2563_s27  ;;  %v2928_v21 = vld [vmem:[%s2849_s26 + $0x60] sm:$0xff] }
  0x35   : > { %396 = vrot.lane.b32.xlu1 %v2772_v22, %s2563_s27 }
  0x36   : > { %394 = vrot.lane.b32.xlu0 %v2778_v25, %s2563_s27 }
  0x38   : > { %2078 = vmatpush3.bf16.xpose.msra.mxu0 %v561_v23  ;;  %v308_v23 = vrot.slane %v2807_v31, 4 }
  0x39   : > { %2235 = vmatprep.subr.msk.bf16.mxu0 %vm544_vm0, %v1875_v24  ;;  %400 = vrot.lane.b32.xlu1 %v2785_v26, %s2563_s27  ;;  %v309_v24 = vrot.slane %v2803_v30, 4 }
  0x3a   : > { %398 = vrot.lane.b32.xlu0 %v2789_v27, %s2563_s27 }
  0x3d   : > { %312 = vrot.lane.b32.xlu1 %v2721_v9, %s2563_s27  ;;  %v366_v9 = vrot.slane %v2778_v25, 4 }
  0x3e   : > { %310 = vrot.lane.b32.xlu0 %v2724_v10, %s2563_s27  ;;  %v367_v10 = vrot.slane %v2772_v22, 4  ;;  %v1902_v22 = vcombine.low %v368_v19, %v369_v20 }
  0x40   : > { %2080 = vmatpush3.bf16.xpose.msra.mxu0 %v564_v28  ;;  %v1901_v12 = vcombine.low %v366_v9, %v367_v10 }
  0x41   : > { %2236 = vmatprep.subr.msk.bf16.mxu0 %vm544_vm0, %v1876_v29  ;;  %316 = vrot.lane.b32.xlu1 %v2803_v30, %s2563_s27  ;;  %v791_v29 = vsel %vm544_vm0, %v1902_v22, 0 }
  0x42   : > { %314 = vrot.lane.b32.xlu0 %v2807_v31, %s2563_s27  ;;  %v788_v14 = vsel %vm544_vm0, %v1901_v12, 0 }
  0x45   : > { %466 = vrot.lane.b32.xlu1 %v2854_v59, %s2563_s27 }
  0x46   : > { %468 = vrot.lane.b32.xlu0 %v2866_v63, %s2563_s27 }
  0x48   : > { %2082 = vmatpush3.bf16.xpose.msra.mxu0 %v567_v32 }
  0x49   : > { %2237 = vmatprep.subr.msk.bf16.mxu0 %vm544_vm0, %v1877_v33  ;;  %470 = vrot.lane.b32.xlu1 %v2859_v61, %s2563_s27  ;;  %v1894_v33 = vcombine.low %v308_v23, %v309_v24 }
  0x4a   : > { %472 = vrot.lane.b32.xlu0 %v2876_v3, %s2563_s27 }
  0x4d   : > { %474 = vrot.lane.b32.xlu1 %v2871_v0, %s2563_s27 }
  0x4e   : > { %476 = vrot.lane.b32.xlu0 %v2890_v7, %s2563_s27 }
  0x50   : > { %2084 = vmatpush3.bf16.xpose.msra.mxu0 %v570_v34 }
  0x51   : > { %2238 = vmatprep.subr.msk.bf16.mxu0 %vm544_vm0, %v1878_v35  ;;  %478 = vrot.lane.b32.xlu1 %v2881_v5, %s2563_s27 }
  0x52   : > { %482 = vrot.lane.b32.xlu0 %v2900_v11, %s2563_s27 }
  0x55   : > { %480 = vrot.lane.b32.xlu1 %v2895_v8, %s2563_s27 }
  0x56   : > { %486 = vrot.lane.b32.xlu0 %v2918_v17, %s2563_s27 }
  0x58   : > { %2086 = vmatpush3.bf16.xpose.msra.mxu0 %v573_v38 }
  0x59   : > { %2247 = vmatprep.subr.msk.bf16.mxu0 %vm544_vm0, %v1895_v41  ;;  %484 = vrot.lane.b32.xlu1 %v2905_v13, %s2563_s27 }
  0x5a   : > { %490 = vrot.lane.b32.xlu0 %v2928_v21, %s2563_s27 }
  0x5d   : > { %488 = vrot.lane.b32.xlu1 %v2921_v18, %s2563_s27 }
  0x5f   : > { %2088 = vmatmul.mubr.msk.bf16.vlgmr.msra.gmra.mrb[0].mxu0 %vm544_vm0, %v1870_v44 }
  0x60   : > { %2112 = vmatpush3.bf16.xpose.msra.mxu0 %v770_v47  ;;  %2127 = vmatprep.mubr.msk.bf16.mxu0 %vm544_vm0, %v1893_v45 }
  0x61   : > { %2248 = vmatprep.subr.msk.bf16.mxu0 %vm544_vm0, %v1896_v46 }
  0x68   : > { %2114 = vmatpush3.bf16.xpose.msra.mxu0 %v773_v48 }
  0x69   : > { %2249 = vmatprep.subr.msk.bf16.mxu0 %vm544_vm0, %v1897_v51 }
  0x70   : > { %2116 = vmatpush3.bf16.xpose.msra.mxu0 %v776_v52 }
  0x71   : > { %2250 = vmatprep.subr.msk.bf16.mxu0 %vm544_vm0, %v1898_v55 }
  0x78   : > { %2118 = vmatpush3.bf16.xpose.msra.mxu0 %v779_v56 }
  0x79   : > { %2251 = vmatprep.subr.msk.bf16.mxu0 %vm544_vm0, %v1899_v60 }
  0x80   : > { %2120 = vmatpush3.bf16.xpose.msra.mxu0 %v782_v62 }
  0x81   : > { %2252 = vmatprep.subr.msk.bf16.mxu0 %vm544_vm0, %v1900_v4 }
  0x88   : > { %2122 = vmatpush3.bf16.xpose.msra.mxu0 %v785_v6 }
  0x89   : > { %2253 = vmatprep.subr.msk.bf16.mxu0 %vm544_vm0, %v1901_v12 }
  0x8f   : > { %v2913_v15 = vpop.permute.xlu0 %370  ;;  %v2915_v16 = vpop.permute.xlu1 %374 }
  0x90   : > { %2124 = vmatpush3.bf16.xpose.msra.mxu0 %v788_v14 }
  0x91   : > { %2254 = vmatprep.subr.msk.bf16.mxu0 %vm544_vm0, %v1902_v22 }
  0x93   : > { %v2934_v25 = vpop.permute.xlu0 %372  ;;  %v2936_v28 = vpop.permute.xlu1 %376 }
  0x94   : > { %v1883_v26 = vcombine.low %v2913_v15, %v2934_v25  ;;  %v1884_v27 = vcombine.low %v2915_v16, %v2936_v28 }
  0x96   : > { %2239 = vmatprep.subr.msk.bf16.mxu1 %vm544_vm0, %v1883_v26  ;;  %v661_v30 = vsel %vm544_vm0, %v1883_v26, 0  ;;  %v664_v42 = vsel %vm544_vm0, %v1884_v27, 0 }
  0x97   : > { %2092 = vmatpush3.bf16.xpose.msra.mxu1 %v661_v30  ;;  %v381_v31 = vpop.permute.xlu1 %380  ;;  %v379_v32 = vpop.permute.xlu0 %378  ;;  %v403_v30 = vrot.slane %v2934_v25, 4 }
  0x98   : > { %2240 = vmatprep.subr.msk.bf16.mxu1 %vm544_vm0, %v1884_v27  ;;  %v407_v34 = vrot.slane %v381_v31, 4  ;;  %v406_v35 = vrot.slane %v379_v32, 4  ;;  %2126 = vmatpush3.bf16.xpose.msra.mxu0 %v791_v29  ;;  %v1885_v38 = vcombine.low %v379_v32, %v381_v31  ;;  %v402_v31 = vrot.slane %v2913_v15, 4 }
  0x9a   : > { %v2949_v36 = vcombine.low %v406_v35, %v407_v34  ;;  %v667_v50 = vsel %vm544_vm0, %v1885_v38, 0 }
  0x9b   : > { %v385_v37 = vpop.permute.xlu1 %384 }
  0x9c   : > { %v409_v39 = vrot.slane %v385_v37, 4  ;;  %v383_v40 = vpop.permute.xlu0 %382 }
  0x9d   : > { %v408_v41 = vrot.slane %v383_v40, 4  ;;  %v1886_v51 = vcombine.low %v383_v40, %v385_v37  ;;  %v405_v40 = vrot.slane %v2936_v28, 4 }
  0x9f   : > { %2094 = vmatpush3.bf16.xpose.msra.mxu1 %v664_v42  ;;  %v2952_v43 = vcombine.low %v408_v41, %v409_v39  ;;  %v389_v44 = vpop.permute.xlu1 %388  ;;  %2128 = vmatmul.mubr.msk.bf16.vlgmr.msra.gmra.mrb[4].mxu0 %vm544_vm0, %v1894_v33  ;;  %v670_v2 = vsel %vm544_vm0, %v1886_v51, 0  ;;  %v1907_v33 = vcombine.low %v402_v31, %v403_v30  ;;  %v404_v39 = vrot.slane %v2915_v16, 4 }
  0xa0   : > { %2241 = vmatprep.subr.msk.bf16.mxu1 %vm544_vm0, %v1885_v38  ;;  %v411_v45 = vrot.slane %v389_v44, 4  ;;  %v387_v46 = vpop.permute.xlu0 %386  ;;  %v885_v16 = vsel %vm544_vm0, %v2949_v36, 0 }
  0xa1   : > { %v410_v47 = vrot.slane %v387_v46, 4  ;;  %v1887_v4 = vcombine.low %v387_v46, %v389_v44  ;;  %v1908_v44 = vcombine.low %v404_v39, %v405_v40  ;;  %v879_v15 = vsel %vm544_vm0, %v1907_v33, 0 }
  0xa2   : > { %v888_v28 = vsel %vm544_vm0, %v2952_v43, 0 }
  0xa3   : > { %v2956_v48 = vcombine.low %v410_v47, %v411_v45  ;;  %v393_v49 = vpop.permute.xlu1 %392  ;;  %v673_v22 = vsel %vm544_vm0, %v1887_v4, 0  ;;  %v882_v25 = vsel %vm544_vm0, %v1908_v44, 0 }
  0xa4   : > { %v413_v52 = vrot.slane %v393_v49, 4  ;;  %v391_v53 = vpop.permute.xlu0 %390 }
  0xa5   : > { %v412_v54 = vrot.slane %v391_v53, 4  ;;  %v1888_v23 = vcombine.low %v391_v53, %v393_v49 }
  0xa7   : > { %2096 = vmatpush3.bf16.xpose.msra.mxu1 %v667_v50  ;;  %v2959_v55 = vcombine.low %v412_v54, %v413_v52  ;;  %v397_v56 = vpop.permute.xlu1 %396  ;;  %v676_v24 = vsel %vm544_vm0, %v1888_v23, 0  ;;  %v891_v50 = vsel %vm544_vm0, %v2956_v48, 0 }
  0xa8   : > { %2242 = vmatprep.subr.msk.bf16.mxu1 %vm544_vm0, %v1886_v51  ;;  %v415_v57 = vrot.slane %v397_v56, 4  ;;  %v395_v58 = vpop.permute.xlu0 %394 }
  0xa9   : > { %v414_v60 = vrot.slane %v395_v58, 4  ;;  %v1889_v26 = vcombine.low %v395_v58, %v397_v56  ;;  %v1918_v56 = vcombine.low %v2859_v61, %v2876_v3  ;;  %v1920_v58 = vcombine.low %v2881_v5, %v2895_v8 }
  0xab   : > { %v2962_v62 = vcombine.low %v414_v60, %v415_v57  ;;  %v401_v1 = vpop.permute.xlu1 %400  ;;  %v679_v27 = vsel %vm544_vm0, %v1889_v26, 0  ;;  %v1919_v57 = vcombine.low %v2871_v0, %v2890_v7 }
  0xac   : > { %v417_v6 = vrot.slane %v401_v1, 4  ;;  %v399_v9 = vpop.permute.xlu0 %398 }
  0xad   : > { %v416_v10 = vrot.slane %v399_v9, 4  ;;  %v1890_v29 = vcombine.low %v399_v9, %v401_v1  ;;  %v897_v51 = vsel %vm544_vm0, %v2962_v62, 0 }
  0xaf   : > { %2098 = vmatpush3.bf16.xpose.msra.mxu1 %v670_v2  ;;  %v1914_v12 = vcombine.low %v416_v10, %v417_v6  ;;  %v313_v14 = vpop.permute.xlu1 %312  ;;  %v682_v32 = vsel %vm544_vm0, %v1890_v29, 0 }
  0xb0   : > { %2243 = vmatprep.subr.msk.bf16.mxu1 %vm544_vm0, %v1887_v4  ;;  %v311_v19 = vpop.permute.xlu0 %310  ;;  %v319_v37 = vrot.slane %v313_v14, 4  ;;  %v1921_v4 = vcombine.low %v2900_v11, %v2905_v13 }
  0xb1   : > { %v1881_v20 = vcombine.low %v311_v19, %v313_v14  ;;  %v318_v38 = vrot.slane %v311_v19, 4  ;;  %v900_v52 = vsel %vm544_vm0, %v1914_v12, 0  ;;  %v1922_v19 = vcombine.low %v2918_v17, %v2921_v18 }
  0xb3   : > { %2107 = vmatprep.mubr.msk.bf16.mxu1 %vm544_vm0, %v1881_v20  ;;  %v317_v34 = vpop.permute.xlu1 %316  ;;  %v1905_v42 = vcombine.low %v318_v38, %v319_v37 }
  0xb4   : > { %v315_v35 = vpop.permute.xlu0 %314  ;;  %v321_v53 = vrot.slane %v317_v34, 4 }
  0xb5   : > { %v1882_v41 = vcombine.low %v315_v35, %v317_v34  ;;  %v320_v54 = vrot.slane %v315_v35, 4 }
  0xb7   : > { %2100 = vmatpush3.bf16.xpose.msra.mxu1 %v673_v22  ;;  %v2994_v45 = vpop.permute.xlu1 %466 }
  0xb8   : > { %2244 = vmatprep.subr.msk.bf16.mxu1 %vm544_vm0, %v1888_v23  ;;  %v498_v46 = vrot.slane %v2994_v45, 4  ;;  %v2997_v47 = vpop.permute.xlu0 %468 }
  0xb9   : > { %v499_v49 = vrot.slane %v2997_v47, 4  ;;  %v1925_v39 = vcombine.low %v2994_v45, %v2997_v47 }
  0xbb   : > { %v3023_v60 = vpop.permute.xlu1 %470 }
  0xbc   : > { %v3026_v1 = vpop.permute.xlu0 %472 }
  0xbd   : > { %v501_v2 = vrot.slane %v3026_v1, 4 }
  0xbf   : > { %2102 = vmatpush3.bf16.xpose.msra.mxu1 %v676_v24  ;;  %v3031_v6 = vpop.permute.xlu1 %474 }
  0xc0   : > { %2245 = vmatprep.subr.msk.bf16.mxu1 %vm544_vm0, %v1889_v26  ;;  %v502_v10 = vrot.slane %v3031_v6, 4  ;;  %v3039_v14 = vpop.permute.xlu0 %476  ;;  %v3049_v26 = vld [vmem:[%s2849_s26 + $0x70] sm:$0xff] }
  0xc1   : > { %v503_v20 = vrot.slane %v3039_v14, 4 }
  0xc3   : > { %v3046_v24 = vpop.permute.xlu1 %478  ;;  %v3054_v30 = vcombine.low %v502_v10, %v503_v20 }
  0xc4   : > { %v3062_v38 = vpop.permute.xlu0 %482 }
  0xc5   : > { %v506_v40 = vrot.slane %v3062_v38, 4 }
  0xc7   : > { %2104 = vmatpush3.bf16.xpose.msra.mxu1 %v679_v27  ;;  %v3052_v27 = vld [vmem:[%s2849_s26 + $0x78] sm:$0xff]  ;;  %v3059_v35 = vpop.permute.xlu1 %480 }
  0xc8   : > { %2246 = vmatprep.subr.msk.bf16.mxu1 %vm544_vm0, %v1890_v29  ;;  %v1924_v34 = vcombine.low %v3049_v26, %v3052_v27  ;;  %v505_v37 = vrot.slane %v3059_v35, 4 }
  0xcf   : > { %2106 = vmatpush3.bf16.xpose.msra.mxu1 %v682_v32 }
  0xd0   : > { %2255 = vmatprep.subr.msk.bf16.mxu1 %vm544_vm0, %v1907_v33  ;;  %v504_v33 = vrot.slane %v3046_v24, 4 }
  0xd6   : > { %2108 = vmatmul.mubr.msk.bf16.vlgmr.msra.gmra.mrb[0].mxu1 %vm544_vm0, %v1882_v41  ;;  %v3067_v41 = vcombine.low %v504_v33, %v505_v37  ;;  %v1928_v37 = vcombine.low %v3046_v24, %v3059_v35  ;;  %v450_v35 = vrot.slane %v2854_v59, 4 }
  0xd7   : > { %2132 = vmatpush3.bf16.xpose.msra.mxu1 %v879_v15  ;;  %2147 = vmatprep.mubr.msk.bf16.mxu1 %vm544_vm0, %v1905_v42  ;;  %v485_v42 = vpop.permute.xlu1 %484 }
  0xd8   : > { %2256 = vmatprep.subr.msk.bf16.mxu1 %vm544_vm0, %v1908_v44  ;;  %v507_v44 = vrot.slane %v485_v42, 4 }
  0xda   : > { %v3069_v15 = vcombine.low %v506_v40, %v507_v44  ;;  %v1929_v40 = vcombine.low %v3062_v38, %v485_v42  ;;  %v451_v38 = vrot.slane %v2866_v63, 4  ;;  %v452_v42 = vrot.slane %v2859_v61, 4 }
  0xdb   : > { %v458_v61 = vrot.slane %v2900_v11, 4 }
  0xdf   : > { %2134 = vmatpush3.bf16.xpose.msra.mxu1 %v882_v25 }
  0xe0   : > { %2257 = vmatprep.subr.msk.bf16.mxu1 %vm544_vm0, %v2949_v36  ;;  %v3000_v36 = vcombine.low %v498_v46, %v499_v49 }
  0xe7   : > { %2136 = vmatpush3.bf16.xpose.msra.mxu1 %v885_v16 }
  0xe8   : > { %2258 = vmatprep.subr.msk.bf16.mxu1 %vm544_vm0, %v2952_v43  ;;  %v894_v43 = vsel %vm544_vm0, %v2959_v55, 0 }
  0xef   : > { %2138 = vmatpush3.bf16.xpose.msra.mxu1 %v888_v28 }
  0xf0   : > { %2259 = vmatprep.subr.msk.bf16.mxu1 %vm544_vm0, %v2956_v48  ;;  %v1917_v48 = vcombine.low %v2854_v59, %v2866_v63  ;;  %v456_v63 = vrot.slane %v2881_v5, 4  ;;  %v462_v5 = vrot.slane %v2928_v21, 4 }
  0xf7   : > { %2140 = vmatpush3.bf16.xpose.msra.mxu1 %v891_v50 }
  0xf8   : > { %2260 = vmatprep.subr.msk.bf16.mxu1 %vm544_vm0, %v2959_v55  ;;  %v1906_v55 = vcombine.low %v320_v54, %v321_v53 }
  0xff   : > { %2142 = vmatpush3.bf16.xpose.msra.mxu1 %v894_v43  ;;  %v3093_v43 = vpop.permute.xlu0 %486 }
 0x100   : > { %2261 = vmatprep.subr.msk.bf16.mxu1 %vm544_vm0, %v2962_v62  ;;  %v500_v62 = vrot.slane %v3023_v60, 4 }
 0x102   : > { %v3033_v9 = vcombine.low %v500_v62, %v501_v2 }
 0x107   : > { %2144 = vmatpush3.bf16.xpose.msra.mxu1 %v897_v51  ;;  %v3095_v51 = vpop.permute.xlu0 %490 }
 0x108   : > { %2262 = vmatprep.subr.msk.bf16.mxu1 %vm544_vm0, %v1914_v12  ;;  %v3037_v12 = vld [vmem:[%s2849_s26 + $0x68] sm:$0xff]  ;;  %s2564_s26 = smov [#allocation3]  }
 0x109   : > { %v1923_v22 = vcombine.low %v2928_v21, %v3037_v12 }
 0x10f   : > { %2146 = vmatpush3.bf16.xpose.msra.mxu1 %v900_v52 }
 0x110   : > { %2151 = vmatprep.subr.bf16.mxu1 %v1917_v48 }
 0x116   : > { %2148 = vmatmul.mubr.msk.bf16.vlgmr.msra.gmra.mrb[4].mxu1 %vm544_vm0, %v1906_v55 }
 0x117   : > { %2152 = vmatpush3.bf16.msra.mxu1 %v1917_v48  ;;  %v3097_v48 = vpop.permute.xlu1 %488 }
 0x118   : > { %2153 = vmatprep.subr.bf16.mxu1 %v1918_v56 }
 0x11b   : > { %2154 = vmatpush3.bf16.msra.mxu1 %v1918_v56 }
 0x11c   : > { %2155 = vmatprep.subr.bf16.mxu1 %v1919_v57 }
 0x11f   : > { %2156 = vmatpush3.bf16.msra.mxu1 %v1919_v57 }
 0x120   : > { %2157 = vmatprep.subr.bf16.mxu1 %v1920_v58 }
 0x123   : > { %2158 = vmatpush3.bf16.msra.mxu1 %v1920_v58 }
 0x124   : > { %2159 = vmatprep.subr.bf16.mxu1 %v1921_v4 }
 0x127   : > { %2160 = vmatpush3.bf16.msra.mxu1 %v1921_v4 }
 0x128   : > { %2161 = vmatprep.subr.bf16.mxu1 %v1922_v19 }
 0x12b   : > { %2162 = vmatpush3.bf16.msra.mxu1 %v1922_v19 }
 0x12c   : > { %2163 = vmatprep.subr.bf16.mxu1 %v1923_v22 }
 0x12f   : > { %2164 = vmatpush3.bf16.msra.mxu1 %v1923_v22 }
 0x130   : > { %2165 = vmatprep.subr.bf16.mxu1 %v1924_v34 }
 0x132   : > { %v2089_v23 = vpop.f32.mrb[0].mxu0 }
 0x133   : > { %955 = vmax.xlane.f32.xlu0 %v2089_v23  ;;  %v609_v29 = vpop.f32.mrb[1].mxu0  ;;  %2166 = vmatpush3.bf16.msra.mxu1 %v1924_v34  ;;  %v1927_v34 = vcombine.low %v3031_v6, %v3039_v14 }
 0x134   : > { %v2090_v31 = vpop.f32.mrb[2].mxu0  ;;  %2171 = vmatprep.subr.bf16.mxu1 %v1925_v39 }
 0x135   : > { %v612_v32 = vpop.f32.mrb[3].mxu0 }
 0x136   : > { %953 = vmax.xlane.f32.xlu1 %v612_v32 }
 0x137   : > { %951 = vmax.xlane.f32.xlu0 %v609_v29 }
 0x13b   : > { %957 = vmax.xlane.f32.xlu0 %v2090_v31 }
 0x147   : > { %492 = vrot.lane.b32.xlu1 %v3037_v12, %s2563_s27 }
 0x172   : > { %v3073_v25 = vpop.f32.mrb[4].mxu0 }
 0x173   : > { %v3075_v16 = vpop.f32.mrb[5].mxu0 }
 0x174   : > { %v3077_v28 = vpop.f32.mrb[6].mxu0 }
 0x175   : > { %v3079_v45 = vpop.f32.mrb[7].mxu0 }
 0x1a9   : > { %v3081_v46 = vpop.f32.mrb[0].mxu1 }
 0x1aa   : > { %v3083_v47 = vpop.f32.mrb[1].mxu1  ;;  %963 = vmax.xlane.f32.xlu1 %v3081_v46 }
 0x1ab   : > { %v3086_v49 = vpop.f32.mrb[2].mxu1 }
 0x1ac   : > { %v3088_v50 = vpop.f32.mrb[3].mxu1  ;;  %965 = vmax.xlane.f32.xlu0 %v3086_v49 }
 0x1ae   : > { %959 = vmax.xlane.f32.xlu1 %v3083_v47 }
 0x1b0   : > { %961 = vmax.xlane.f32.xlu0 %v3088_v50 }
 0x1bf   : > { %496 = vrot.lane.b32.xlu1 %v3052_v27, %s2563_s27 }
 0x1c0   : > { %v956_v52 = vpop.xlane.xlu0 %955 }
 0x1c1   : > { %v985_v54 = vsub.f32 %v2089_v23, %v956_v52  ;;  %v453_v52 = vrot.slane %v2876_v3, 4  ;;  %v459_v3 = vrot.slane %v2905_v13, 4  ;;  %v464_v13 = vrot.slane %v3049_v26, 4 }
 0x1c3   : > { %v954_v53 = vpop.xlane.xlu1 %953  ;;  %v1003_v2 = vmul.f32 1.442695, %v985_v54  ;;  %v454_v54 = vrot.slane %v2871_v0, 4  ;;  %v1934_v59 = vcombine.low %v452_v42, %v453_v52  ;;  %v460_v0 = vrot.slane %v2918_v17, 4 }
 0x1c4   : > { %v984_v55 = vsub.f32 %v612_v32, %v954_v53  ;;  %v952_v56 = vpop.xlane.xlu0 %951  ;;  %v1933_v53 = vcombine.low %v450_v35, %v451_v38  ;;  %v508_v42 = vrot.slane %v3093_v43, 4  ;;  %v509_v52 = vrot.slane %v3097_v48, 4 }
 0x1c5   : > { %v983_v57 = vsub.f32 %v609_v29, %v952_v56  ;;  %v457_v56 = vrot.slane %v2895_v8, 4  ;;  %v463_v8 = vrot.slane %v3037_v12, 4 }
 0x1c6   : > { %v1001_v58 = vmul.f32 1.442695, %v984_v55  ;;  %494 = vrot.lane.b32.xlu0 %v3049_v26, %s2563_s27  ;;  %2191 = vmatprep.subr.bf16.mxu0 %v1933_v53  ;;  %v455_v55 = vrot.slane %v2890_v7, 4  ;;  %v461_v7 = vrot.slane %v2921_v18, 4 }
 0x1c7   : > { %v999_v62 = vmul.f32 1.442695, %v983_v57  ;;  %2192 = vmatpush3.bf16.msra.mxu0 %v1933_v53  ;;  %v1939_v11 = vcombine.low %v462_v5, %v463_v8  ;;  %v1946_v53 = vcombine.low %v508_v42, %v509_v52 }
 0x1c8   : > { %2403 = vpow2.f32 %v1001_v58  ;;  %v958_v4 = vpop.xlane.xlu0 %957  ;;  %2193 = vmatprep.subr.bf16.mxu0 %v1934_v59  ;;  %v1935_v57 = vcombine.low %v454_v54, %v455_v55  ;;  %v1936_v58 = vcombine.low %v456_v63, %v457_v56 }
 0x1c9   : > { %2405 = vpow2.f32 %v999_v62  ;;  %v986_v10 = vsub.f32 %v2090_v31, %v958_v4  ;;  %v1926_v31 = vcombine.low %v3023_v60, %v3026_v1  ;;  %v3124_v60 = vpop.permute.xlu1 %492  ;;  %v1930_v1 = vcombine.low %v3093_v43, %v3097_v48 }
 0x1ca   : > { %2407 = vpow2.f32 %v1003_v2  ;;  %v1931_v24 = vcombine.low %v3095_v51, %v3124_v60  ;;  %v1937_v62 = vcombine.low %v458_v61, %v459_v3  ;;  %v1938_v2 = vcombine.low %v460_v0, %v461_v7 }
 0x1cb   : > { %v1005_v19 = vmul.f32 1.442695, %v986_v10  ;;  %2194 = vmatpush3.bf16.msra.mxu0 %v1934_v59  ;;  %v465_v4 = vrot.slane %v3052_v27, 4  ;;  %v511_v54 = vrot.slane %v3124_v60, 4 }
 0x1cc   : > { %2195 = vmatprep.subr.bf16.mxu0 %v1935_v57 }
 0x1cd   : > { %2409 = vpow2.f32 %v1005_v19  ;;  %v1940_v17 = vcombine.low %v464_v13, %v465_v4 }
 0x1cf   : > { %2196 = vmatpush3.bf16.msra.mxu0 %v1935_v57 }
 0x1d0   : > { %2197 = vmatprep.subr.bf16.mxu0 %v1936_v58 }
 0x1d2   : > { %v3103_v20 = vpop.eup %2403 }
 0x1d3   : > { %v3105_v22 = vpop.eup %2405  ;;  %2198 = vmatpush3.bf16.msra.mxu0 %v1936_v58 }
 0x1d4   : > { %v1063_v23 = vpack.c.bf16 %v3103_v20, %v3105_v22  ;;  %v3109_v29 = vpop.eup %2407  ;;  %2199 = vmatprep.subr.bf16.mxu0 %v1937_v62 }
 0x1d6   : > { %2167 = vmatprep.mubr.bf16.mxu1 %v1063_v23 }
 0x1d7   : > { %v3111_v32 = vpop.eup %2409  ;;  %2200 = vmatpush3.bf16.msra.mxu0 %v1937_v62 }
 0x1d8   : > { %v1064_v33 = vpack.c.bf16 %v3111_v32, %v3109_v29  ;;  %2201 = vmatprep.subr.bf16.mxu0 %v1938_v2 }
 0x1da   : > { %2168 = vmatmul.mubr.bf16.vlgmr.msra.gmra.mrb[8].mxu1 %v1064_v33 }
 0x1db   : > { %2172 = vmatpush3.bf16.msra.mxu1 %v1925_v39  ;;  %2202 = vmatpush3.bf16.msra.mxu0 %v1938_v2 }
 0x1dc   : > { %2173 = vmatprep.subr.bf16.mxu1 %v1926_v31  ;;  %2203 = vmatprep.subr.bf16.mxu0 %v1939_v11 }
 0x1df   : > { %2174 = vmatpush3.bf16.msra.mxu1 %v1926_v31  ;;  %2204 = vmatpush3.bf16.msra.mxu0 %v1939_v11 }
 0x1e0   : > { %2175 = vmatprep.subr.bf16.mxu1 %v1927_v34  ;;  %2205 = vmatprep.subr.bf16.mxu0 %v1940_v17 }
 0x1e3   : > { %2176 = vmatpush3.bf16.msra.mxu1 %v1927_v34  ;;  %2206 = vmatpush3.bf16.msra.mxu0 %v1940_v17 }
 0x1e4   : > { %2177 = vmatprep.subr.bf16.mxu1 %v1928_v37 }
 0x1e7   : > { %2178 = vmatpush3.bf16.msra.mxu1 %v1928_v37 }
 0x1e8   : > { %2179 = vmatprep.subr.bf16.mxu1 %v1929_v40 }
 0x1e9   : > { %v3122_v44 = vpop.f32.mrb[4].mxu1 }
 0x1ea   : > { %v3128_v39 = vpop.f32.mrb[5].mxu1 }
 0x1eb   : > { %2180 = vmatpush3.bf16.msra.mxu1 %v1929_v40  ;;  %v3130_v6 = vpop.f32.mrb[6].mxu1  ;;  %975 = vmax.xlane.f32.xlu0 %v3128_v39 }
 0x1ec   : > { %2181 = vmatprep.subr.bf16.mxu1 %v1930_v1  ;;  %v3133_v14 = vpop.f32.mrb[7].mxu1 }
 0x1ed   : > { %977 = vmax.xlane.f32.xlu1 %v3133_v14 }
 0x1ef   : > { %2182 = vmatpush3.bf16.msra.mxu1 %v1930_v1  ;;  %979 = vmax.xlane.f32.xlu0 %v3122_v44 }
 0x1f0   : > { %2183 = vmatprep.subr.bf16.mxu1 %v1931_v24 }
 0x1f1   : > { %967 = vmax.xlane.f32.xlu1 %v3075_v16 }
 0x1f3   : > { %981 = vmax.xlane.f32.xlu0 %v3130_v6  ;;  %2184 = vmatpush3.bf16.msra.mxu1 %v1931_v24 }
 0x1f5   : > { %971 = vmax.xlane.f32.xlu1 %v3073_v25 }
 0x1f7   : > { %969 = vmax.xlane.f32.xlu0 %v3079_v45 }
 0x1fb   : > { %973 = vmax.xlane.f32.xlu0 %v3077_v28 }
 0x237   : > { %v964_v18 = vpop.xlane.xlu1 %963 }
 0x238   : > { %v989_v12 = vsub.f32 %v3081_v46, %v964_v18 }
 0x239   : > { %v966_v10 = vpop.xlane.xlu0 %965 }
 0x23a   : > { %v990_v21 = vsub.f32 %v3086_v49, %v966_v10  ;;  %v1011_v37 = vmul.f32 1.442695, %v989_v12 }
 0x23b   : > { %v960_v19 = vpop.xlane.xlu1 %959 }
 0x23c   : > { %v1013_v23 = vmul.f32 1.442695, %v990_v21  ;;  %v987_v33 = vsub.f32 %v3083_v47, %v960_v19 }
 0x23d   : > { %v962_v31 = vpop.xlane.xlu0 %961 }
 0x23e   : > { %v1007_v34 = vmul.f32 1.442695, %v987_v33  ;;  %v988_v26 = vsub.f32 %v3088_v50, %v962_v31  ;;  %2411 = vpow2.f32 %v1013_v23 }
 0x23f   : > { %v497_v27 = vpop.permute.xlu1 %496 }
 0x240   : > { %v1009_v40 = vmul.f32 1.442695, %v988_v26  ;;  %2413 = vpow2.f32 %v1007_v34 }
 0x241   : > { %v495_v1 = vpop.permute.xlu0 %494 }
 0x242   : > { %2415 = vpow2.f32 %v1009_v40  ;;  %v1932_v24 = vcombine.low %v495_v1, %v497_v27  ;;  %v512_v55 = vrot.slane %v495_v1, 4 }
 0x243   : > { %2417 = vpow2.f32 %v1011_v37 }
 0x244   : > { %2185 = vmatprep.subr.bf16.mxu1 %v1932_v24 }
 0x245   : > { %2186 = vmatpush3.bf16.msra.mxu1 %v1932_v24  ;;  %v2360_v24 = vld [vmem:[%s3427_s3 + $0x14] ss:$8 sps:$4 sm:$0xff]  }
 0x246   : > { %2211 = vmatprep.subr.bf16.mxu1 %v3000_v36 }
 0x248   : > { %v3165_v46 = vpop.eup %2411 }
 0x24a   : > { %v3167_v47 = vpop.eup %2413 }
 0x24c   : > { %v3169_v49 = vpop.eup %2415 }
 0x24d   : > { %v3171_v50 = vpop.eup %2417  ;;  %v1065_v35 = vpack.c.bf16 %v3169_v49, %v3167_v47 }
 0x24e   : > { %v1066_v38 = vpack.c.bf16 %v3165_v46, %v3171_v50 }
 0x24f   : > { %2187 = vmatprep.mubr.bf16.mxu1 %v1065_v35 }
 0x250   : > { %2188 = vmatmul.mubr.bf16.vlgmr.msra.gmra.mrb[12].mxu1 %v1066_v38 }
 0x251   : > { %2212 = vmatpush3.bf16.msra.mxu1 %v3000_v36  ;;  %v510_v36 = vrot.slane %v3095_v51, 4 }
 0x252   : > { %2213 = vmatprep.subr.bf16.mxu1 %v3033_v9 }
 0x255   : > { %2214 = vmatpush3.bf16.msra.mxu1 %v3033_v9  ;;  %v1947_v9 = vcombine.low %v510_v36, %v511_v54 }
 0x256   : > { %2215 = vmatprep.subr.bf16.mxu1 %v3054_v30 }
 0x259   : > { %2216 = vmatpush3.bf16.msra.mxu1 %v3054_v30  ;;  %v513_v30 = vrot.slane %v497_v27, 4 }
 0x25a   : > { %2217 = vmatprep.subr.bf16.mxu1 %v3067_v41 }
 0x25b   : > { %v1948_v43 = vcombine.low %v512_v55, %v513_v30  ;;  %v2366_v30 = vld [vmem:[%s3427_s3 + $0x34] ss:$8 sps:$4 sm:$0xff]  }
 0x25d   : > { %2218 = vmatpush3.bf16.msra.mxu1 %v3067_v41 }
 0x25e   : > { %2219 = vmatprep.subr.bf16.mxu1 %v3069_v15 }
 0x261   : > { %2220 = vmatpush3.bf16.msra.mxu1 %v3069_v15 }
 0x262   : > { %2221 = vmatprep.subr.bf16.mxu1 %v1946_v53 }
 0x265   : > { %2222 = vmatpush3.bf16.msra.mxu1 %v1946_v53  ;;  %v2361_v53 = vld [vmem:[%s3427_s3 + $0x20] ss:$8 sps:$4 sm:$0xff]  }
 0x266   : > { %2223 = vmatprep.subr.bf16.mxu1 %v1947_v9 }
 0x269   : > { %2224 = vmatpush3.bf16.msra.mxu1 %v1947_v9 }
 0x26a   : > { %2225 = vmatprep.subr.bf16.mxu1 %v1948_v43 }
 0x26d   : > { %2226 = vmatpush3.bf16.msra.mxu1 %v1948_v43 }
 0x278   : > { %v976_v41 = vpop.xlane.xlu0 %975 }
 0x279   : > { %v995_v48 = vsub.f32 %v3128_v39, %v976_v41 }
 0x27a   : > { %v978_v59 = vpop.xlane.xlu1 %977 }
 0x27b   : > { %v1023_v51 = vmul.f32 1.442695, %v995_v48  ;;  %v996_v63 = vsub.f32 %v3133_v14, %v978_v59 }
 0x27c   : > { %v980_v60 = vpop.xlane.xlu0 %979 }
 0x27d   : > { %2419 = vpow2.f32 %v1023_v51  ;;  %v1025_v15 = vmul.f32 1.442695, %v996_v63  ;;  %v997_v56 = vsub.f32 %v3122_v44, %v980_v60  ;;  %v2364_v51 = vld [vmem:[%s3427_s3 + $0x30] ss:$8 sps:$4 sm:$0xff]   ;;  %v2369_v63 = vld [vmem:[%s3427_s3 + $0x44] ss:$8 sps:$4 sm:$0xff]  }
 0x27e   : > { %v968_v57 = vpop.xlane.xlu1 %967 }
 0x27f   : > { %2421 = vpow2.f32 %v1025_v15  ;;  %v1027_v61 = vmul.f32 1.442695, %v997_v56  ;;  %v991_v3 = vsub.f32 %v3075_v16, %v968_v57 }
 0x280   : > { %v982_v58 = vpop.xlane.xlu0 %981 }
 0x281   : > { %v998_v0 = vsub.f32 %v3130_v6, %v982_v58  ;;  %2423 = vpow2.f32 %v1027_v61  ;;  %v1015_v39 = vmul.f32 1.442695, %v991_v3  ;;  %v2367_v61 = vld [vmem:[%s3427_s3 + $0x40] ss:$8 sps:$4 sm:$0xff]   ;;  %v2372_v58 = vld [vmem:[%s3427_s3 + $0x54] ss:$8 sps:$4 sm:$0xff]  }
 0x282   : > { %v972_v7 = vpop.xlane.xlu1 %971 }
 0x283   : > { %v1029_v62 = vmul.f32 1.442695, %v998_v0  ;;  %v993_v5 = vsub.f32 %v3073_v25, %v972_v7 }
 0x284   : > { %v970_v14 = vpop.xlane.xlu0 %969 }
 0x285   : > { %2425 = vpow2.f32 %v1029_v62  ;;  %v992_v8 = vsub.f32 %v3079_v45, %v970_v14  ;;  %v1019_v11 = vmul.f32 1.442695, %v993_v5  ;;  %v2370_v5 = vld [vmem:[%s3427_s3 + $0x50] ss:$8 sps:$4 sm:$0xff]   ;;  %v2375_v14 = vld [vmem:[%s3427_s3 + $0x64] ss:$8 sps:$4 sm:$0xff]  }
 0x286   : > { %2427 = vpow2.f32 %v1015_v39 }
 0x287   : > { %v2420_v2 = vpop.eup %2419  ;;  %v1017_v44 = vmul.f32 1.442695, %v992_v8 }
 0x288   : > { %1055 = vadd.xlane.f32.xlu1 %v2420_v2  ;;  %v974_v13 = vpop.xlane.xlu0 %973 }
 0x289   : > { %v2422_v16 = vpop.eup %2421  ;;  %2429 = vpow2.f32 %v1017_v44  ;;  %v994_v6 = vsub.f32 %v3077_v28, %v974_v13  ;;  %v2373_v44 = vld [vmem:[%s3427_s3 + $0x60] ss:$8 sps:$4 sm:$0xff]   ;;  %v2378_v13 = vld [vmem:[%s3427_s3 + $0x74] ss:$8 sps:$4 sm:$0xff]  }
 0x28a   : > { %1057 = vadd.xlane.f32.xlu0 %v2422_v16  ;;  %v1069_v4 = vpack.c.bf16 %v2422_v16, %v2420_v2  ;;  %2431 = vpow2.f32 %v1019_v11 }
 0x28b   : > { %v1021_v17 = vmul.f32 1.442695, %v994_v6  ;;  %v2424_v25 = vpop.eup %2423 }
 0x28c   : > { %2227 = vmatprep.mubr.bf16.mxu1 %v1069_v4  ;;  %1039 = vadd.xlane.f32.xlu1 %v3167_v47  ;;  %v2358_v47 = vld [vmem:[%s3427_s3 + $0x10] ss:$8 sps:$4 sm:$0xff]  }
 0x28d   : > { %2433 = vpow2.f32 %v1021_v17  ;;  %v2376_v17 = vld [vmem:[%s3427_s3 + $0x70] ss:$8 sps:$4 sm:$0xff]  }
 0x28e   : > { %1041 = vadd.xlane.f32.xlu0 %v3169_v49  ;;  %v2363_v49 = vld [vmem:[%s3427_s3 + $0x24] ss:$8 sps:$4 sm:$0xff]  }
 0x28f   : > { %v2426_v45 = vpop.eup %2425 }
 0x290   : > { %1059 = vadd.xlane.f32.xlu1 %v2424_v25  ;;  %v1070_v18 = vpack.c.bf16 %v2426_v45, %v2424_v25  ;;  %v2428_v10 = vpop.eup %2427  ;;  %v2381_v25 = vld [vmem:[%s3427_s3 + $0x84] ss:$8 sps:$4 sm:$0xff]  }
 0x292   : > { %2228 = vmatmul.mubr.bf16.vlgmr.msra.gmra.mrb[16].mxu1 %v1070_v18  ;;  %1061 = vadd.xlane.f32.xlu0 %v2426_v45  ;;  %v2379_v18 = vld [vmem:[%s3427_s3 + $0x80] ss:$8 sps:$4 sm:$0xff]  }
 0x293   : > { %v2430_v21 = vpop.eup %2429 }
 0x294   : > { %1043 = vadd.xlane.f32.xlu1 %v3171_v50  ;;  %v1067_v28 = vpack.c.bf16 %v2430_v21, %v2428_v10  ;;  %v2432_v12 = vpop.eup %2431 }
 0x296   : > { %1045 = vadd.xlane.f32.xlu0 %v3165_v46  ;;  %2207 = vmatprep.mubr.bf16.mxu0 %v1067_v28 }
 0x297   : > { %v2434_v19 = vpop.eup %2433 }
 0x298   : > { %1047 = vadd.xlane.f32.xlu1 %v2428_v10  ;;  %v1068_v23 = vpack.c.bf16 %v2434_v19, %v2432_v12 }
 0x29a   : > { %1049 = vadd.xlane.f32.xlu0 %v2430_v21  ;;  %2208 = vmatmul.mubr.bf16.vlgmr.msra.gmra.mrb[8].mxu0 %v1068_v23  ;;  %v2384_v21 = vld [vmem:[%s3427_s3 + $0x94] ss:$8 sps:$4 sm:$0xff]  }
 0x29c   : > { %1031 = vadd.xlane.f32.xlu1 %v3105_v22 }
 0x29e   : > { %1033 = vadd.xlane.f32.xlu0 %v3103_v20 }
 0x2a0   : > { %1051 = vadd.xlane.f32.xlu1 %v2432_v12 }
 0x2a2   : > { %1053 = vadd.xlane.f32.xlu0 %v2434_v19  ;;  %v2382_v19 = vld [vmem:[%s3427_s3 + $0x90] ss:$8 sps:$4 sm:$0xff]  }
 0x2a4   : > { %1035 = vadd.xlane.f32.xlu1 %v3109_v29  ;;  %v2355_v29 = vld [vmem:[%s3427_s3] ss:$8 sps:$4 sm:$0xff]  }
 0x2a6   : > { %1037 = vadd.xlane.f32.xlu0 %v3111_v32  ;;  %v2357_v32 = vld [vmem:[%s3427_s3 + $0x4] ss:$8 sps:$4 sm:$0xff]  }
 0x2a7   : > { %1668 = vmatprep.subr.bf16.mxu0 %v2357_v32  ;;  %v2394_v32 = vld [vmem:[%s3427_s3 + $0xd0] ss:$8 sps:$4 sm:$0xff]  }
 0x2a8   : > { %1669 = vmatpush1.bf16.msra.mxu0 %v2355_v29  ;;  %v2396_v29 = vld [vmem:[%s3427_s3 + $0xd4] ss:$8 sps:$4 sm:$0xff]  }
 0x2a9   : > { %1670 = vmatprep.subr.bf16.mxu0 %v2360_v24  ;;  %v2397_v24 = vld [vmem:[%s3427_s3 + $0xe0] ss:$8 sps:$4 sm:$0xff]  }
 0x2ac   : > { %1671 = vmatpush1.bf16.msra.mxu0 %v2358_v47 }
 0x2ad   : > { %v3206_v33 = vpop.f32.mrb[8].mxu1  ;;  %1672 = vmatprep.subr.bf16.mxu0 %v2363_v49 }
 0x2ae   : > { %v3208_v31 = vpop.f32.mrb[9].mxu1 }
 0x2af   : > { %v3210_v34 = vpop.f32.mrb[10].mxu1 }
 0x2b0   : > { %v3212_v26 = vpop.f32.mrb[11].mxu1  ;;  %1673 = vmatpush1.bf16.msra.mxu0 %v2361_v53 }
 0x2b1   : > { %1674 = vmatprep.subr.bf16.mxu0 %v2366_v30 }
 0x2b4   : > { %1675 = vmatpush1.bf16.msra.mxu0 %v2364_v51 }
 0x2b5   : > { %1676 = vmatprep.subr.bf16.mxu0 %v2369_v63 }
 0x2b8   : > { %1677 = vmatpush1.bf16.msra.mxu0 %v2367_v61 }
 0x2b9   : > { %1678 = vmatprep.subr.bf16.mxu0 %v2372_v58 }
 0x2bc   : > { %1679 = vmatpush1.bf16.msra.mxu0 %v2370_v5 }
 0x2bd   : > { %1680 = vmatprep.subr.bf16.mxu0 %v2375_v14 }
 0x2c0   : > { %1681 = vmatpush1.bf16.msra.mxu0 %v2373_v44 }
 0x2c1   : > { %1682 = vmatprep.subr.bf16.mxu0 %v2378_v13 }
 0x2c4   : > { %1683 = vmatpush1.bf16.msra.mxu0 %v2376_v17 }
 0x2c5   : > { %1684 = vmatprep.subr.bf16.mxu0 %v2381_v25 }
 0x2c8   : > { %1685 = vmatpush1.bf16.msra.mxu0 %v2379_v18 }
 0x2c9   : > { %1686 = vmatprep.subr.bf16.mxu0 %v2384_v21 }
 0x2cc   : > { %1687 = vmatpush1.bf16.msra.mxu0 %v2382_v19 }
 0x315   : > { %v3214_v37 = vpop.xlane.xlu1 %1055 }
 0x317   : > { %v3216_v27 = vpop.xlane.xlu0 %1057 }
 0x319   : > { %v1040_v22 = vpop.xlane.xlu1 %1039 }
 0x31a   : > { %2435 = vrcp.f32 %v1040_v22  ;;  %v2393_v22 = vld [vmem:[%s3427_s3 + $0xc4] ss:$8 sps:$4 sm:$0xff]  }
 0x31b   : > { %v1042_v20 = vpop.xlane.xlu0 %1041 }
 0x31c   : > { %2437 = vrcp.f32 %v1042_v20  ;;  %v2391_v20 = vld [vmem:[%s3427_s3 + $0xc0] ss:$8 sps:$4 sm:$0xff]  }
 0x31d   : > { %v3218_v40 = vpop.xlane.xlu1 %1059 }
 0x31f   : > { %v3226_v1 = vpop.xlane.xlu0 %1061 }
 0x321   : > { %v1044_v46 = vpop.xlane.xlu1 %1043 }
 0x322   : > { %2439 = vrcp.f32 %v1044_v46  ;;  %v2399_v46 = vld [vmem:[%s3427_s3 + $0xe4] ss:$8 sps:$4 sm:$0xff]  }
 0x323   : > { %v2189_v50 = vpop.f32.mrb[12].mxu1  ;;  %v1046_v35 = vpop.xlane.xlu0 %1045 }
 0x324   : > { %v2436_v38 = vpop.eup %2435  ;;  %2441 = vrcp.f32 %v1046_v35  ;;  %v1218_v42 = vpop.f32.mrb[13].mxu1 }
 0x325   : > { %v2190_v52 = vpop.f32.mrb[14].mxu1  ;;  %v3237_v36 = vpop.xlane.xlu1 %1047  ;;  %v1415_v55 = vmul.f32 %v2436_v38, %v1218_v42 }
 0x326   : > { %v2438_v54 = vpop.eup %2437  ;;  %v1221_v9 = vpop.f32.mrb[15].mxu1 }
 0x327   : > { %v1416_v43 = vmul.f32 %v2438_v54, %v1221_v9  ;;  %v3245_v41 = vpop.xlane.xlu0 %1049 }
 0x329   : > { %v1431_v48 = vpack.c.bf16 %v1416_v43, %v1415_v55  ;;  %v1032_v59 = vpop.xlane.xlu1 %1031 }
 0x32a   : > { %2443 = vrcp.f32 %v1032_v59 }
 0x32b   : > { %1435 = vrot.lane.b32.xlu0 %v1431_v48, %s2563_s27  ;;  %v1034_v60 = vpop.xlane.xlu0 %1033 }
 0x32c   : > { %v2440_v15 = vpop.eup %2439  ;;  %2445 = vrcp.f32 %v1034_v60 }
 0x32d   : > { %v3254_v56 = vmul.f32 %v2440_v15, %v2189_v50  ;;  %v3256_v57 = vpop.xlane.xlu1 %1051 }
 0x32e   : > { %v2442_v3 = vpop.eup %2441 }
 0x32f   : > { %v3264_v0 = vmul.f32 %v2442_v3, %v2190_v52  ;;  %v3266_v7 = vpop.xlane.xlu0 %1053 }
 0x331   : > { %v1432_v62 = vpack.c.bf16 %v3264_v0, %v3254_v56  ;;  %v1036_v39 = vpop.xlane.xlu1 %1035  ;;  %v1498_v56 = vlaneseq }
 0x332   : > { %2447 = vrcp.f32 %v1036_v39 }
 0x333   : > { %v1038_v8 = vpop.xlane.xlu0 %1037  ;;  %v1499_v0 = vshrl.u32 %v1498_v56, 7 }
 0x334   : > { %v2444_v2 = vpop.eup %2443  ;;  %2449 = vrcp.f32 %v1038_v8 }
 0x335   : > { %v1411_v16 = vmul.f32 %v2444_v2, %v3208_v31  ;;  %v2387_v31 = vld [vmem:[%s3427_s3 + $0xa4] ss:$8 sps:$4 sm:$0xff]   ;;  %2451 = vrcp.f32 %v3218_v40 }
 0x336   : > { %v2446_v11 = vpop.eup %2445  ;;  %1688 = vmatprep.subr.bf16.mxu0 %v2387_v31  ;;  %2453 = vrcp.f32 %v3214_v37  ;;  %v2400_v37 = vld [vmem:[%s3427_s3 + $0xf0] ss:$8 sps:$4 sm:$0xff]  }
 0x337   : > { %v1412_v6 = vmul.f32 %v2446_v11, %v3212_v26  ;;  %v2388_v26 = vld [vmem:[%s3427_s3 + $0xb0] ss:$8 sps:$4 sm:$0xff]   ;;  %2455 = vrcp.f32 %v3226_v1 }
 0x338   : > { %2457 = vrcp.f32 %v3216_v27  ;;  %v2402_v27 = vld [vmem:[%s3427_s3 + $0xf4] ss:$8 sps:$4 sm:$0xff]  }
 0x339   : > { %v1427_v4 = vpack.c.bf16 %v1412_v6, %v1411_v16  ;;  %2459 = vrcp.f32 %v3237_v36  ;;  %v1496_v16 = vld [vmem:[%s3428_s4] sm:$0x3]  ;;  %v1504_v6 = vsub.s32 1, %v1499_v0 }
 0x33a   : > { %2461 = vrcp.f32 %v3256_v57 }
 0x33b   : > { %1429 = vst.msk [vmem:[#allocation2] sm:$0xff] %vm544_vm0, %v1427_v4  ;;  %2463 = vrcp.f32 %v3266_v7  ;;  %v1505_v17 = vrot.slane %v1496_v16, %v1504_v6 }
 0x33c   : > { %v2448_v45 = vpop.eup %2447  ;;  %2465 = vrcp.f32 %v3245_v41 }
 0x33d   : > { %v1413_v28 = vmul.f32 %v2448_v45, %v3206_v33  ;;  %v2385_v33 = vld [vmem:[%s3427_s3 + $0xa0] ss:$8 sps:$4 sm:$0xff]  }
 0x33e   : > { %v2450_v10 = vpop.eup %2449  ;;  %1689 = vmatpush1.bf16.msra.mxu0 %v2385_v33 }
 0x33f   : > { %v1414_v12 = vmul.f32 %v2450_v10, %v3210_v34  ;;  %v2390_v34 = vld [vmem:[%s3427_s3 + $0xb4] ss:$8 sps:$4 sm:$0xff]   ;;  %v2452_v40 = vpop.eup %2451 }
 0x340   : > { %1690 = vmatprep.subr.bf16.mxu0 %v2390_v34  ;;  %v2454_v47 = vpop.eup %2453 }
 0x341   : > { %v1428_v23 = vpack.c.bf16 %v1414_v12, %v1413_v28  ;;  %v2456_v35 = vpop.eup %2455 }
 0x342   : > { %1691 = vmatpush1.bf16.msra.mxu0 %v2388_v26  ;;  %v2458_v52 = vpop.eup %2457 }
 0x343   : > { %1430 = vst.msk [vmem:[#allocation2 + $0x10] sm:$0xff] %vm544_vm0, %v1428_v23  ;;  %1692 = vmatprep.subr.bf16.mxu0 %v2393_v22  ;;  %v2460_v55 = vpop.eup %2459 }
 0x344   : > { %v2462_v48 = vpop.eup %2461 }
 0x345   : > { %v2464_v41 = vpop.eup %2463 }
 0x346   : > { %1693 = vmatpush1.bf16.msra.mxu0 %v2391_v20  ;;  %v2466_v63 = vpop.eup %2465 }
 0x347   : > { %1694 = vmatprep.subr.bf16.mxu0 %v2396_v29 }
 0x34a   : > { %1695 = vmatpush1.bf16.msra.mxu0 %v2394_v32 }
 0x34b   : > { %1696 = vmatprep.subr.bf16.mxu0 %v2399_v46 }
 0x34e   : > { %1697 = vmatpush1.bf16.msra.mxu0 %v2397_v24 }
 0x34f   : > { %1698 = vmatprep.subr.bf16.mxu0 %v2402_v27 }
 0x352   : > { %1699 = vmatpush1.bf16.msra.mxu0 %v2400_v37 }
 0x365   : > { %v2229_v1 = vpop.f32.mrb[16].mxu1 }
 0x366   : > { %v1425_v49 = vmul.f32 %v2452_v40, %v2229_v1  ;;  %v1380_v50 = vpop.f32.mrb[17].mxu1 }
 0x367   : > { %v1423_v38 = vmul.f32 %v2454_v47, %v1380_v50  ;;  %v2230_v42 = vpop.f32.mrb[18].mxu1 }
 0x368   : > { %v1426_v36 = vmul.f32 %v2456_v35, %v2230_v42  ;;  %v1383_v53 = vpop.f32.mrb[19].mxu1 }
 0x369   : > { %v1424_v54 = vmul.f32 %v2458_v52, %v1383_v53 }
 0x36a   : > { %v1449_v9 = vpack.c.bf16 %v1426_v36, %v1425_v49 }
 0x36b   : > { %v1448_v30 = vpack.c.bf16 %v1424_v54, %v1423_v38 }
 0x36d   : > { %v2209_v43 = vpop.f32.mrb[8].mxu0  ;;  %1452 = vrot.lane.b32.xlu1 %v1448_v30, %s2563_s27 }
 0x36e   : > { %v1299_v59 = vpop.f32.mrb[9].mxu0  ;;  %v1421_v60 = vmul.f32 %v2462_v48, %v2209_v43 }
 0x36f   : > { %v2210_v51 = vpop.f32.mrb[10].mxu0  ;;  %v1419_v61 = vmul.f32 %v2460_v55, %v1299_v59 }
 0x370   : > { %v1422_v15 = vmul.f32 %v2464_v41, %v2210_v51  ;;  %v1302_v57 = vpop.f32.mrb[11].mxu0 }
 0x371   : > { %v1420_v3 = vmul.f32 %v2466_v63, %v1302_v57  ;;  %1454 = vrot.lane.b32.xlu1 %v1449_v9, %s2563_s27 }
 0x372   : > { %v1445_v58 = vpack.c.bf16 %v1422_v15, %v1421_v60 }
 0x373   : > { %v1444_v7 = vpack.c.bf16 %v1420_v3, %v1419_v61 }
 0x374   : > { %1447 = vst.msk [vmem:[#allocation2 + $0x18] sm:$0xff] %vm544_vm0, %v1445_v58 }
 0x375   : > { %1446 = vst.msk [vmem:[#allocation2 + $0x8] sm:$0xff] %vm544_vm0, %v1444_v7  ;;  %1437 = vrot.lane.b32.xlu1 %v1432_v62, %s2563_s27  ;;  %v1500_v62 = vsub.s32 0, %v1499_v0  ;;  %s272_s27 = sand.u32 1, %s2537_s19  }
 0x376   : > { %s1860_s13 = sshll.u32 %s272_s27, 6  ;;  %s3372_s16 = scalar_lea.sflag [#allocation4], %s272_s27 }
 0x377   : > { %v1501_v4 = vrot.slane %v1496_v16, %v1500_v62  ;;  %s274_s8 = scalar_lea.vmem [#allocation3], %s1860_s13  ;;  %s2471_s13 = sshll.u32 %s2564_s26, 4  ;;  %s2472_s13 = int_to_ptr.vmem [resolvable:$false] %s2471_s13 }
 0x378   : > { %s1746_s15 = sshll.u32 %s274_s8, 4  ;;  %s2473_s14 = scalar_lea.vmem %s2472_s13, 2048  ;;  %s3368_s15 = int_to_ptr.vmem [resolvable:$true] %s1746_s15 }
 0x379   : > { %s2467_s17 = scalar_lea.vmem %s3368_s15, 1024  ;;  %p2474_p4 = scmp.lt.s32.totalorder %s3368_s15, %s2472_s13 }
 0x37a   : > { %p2468_p0 = scmp.ne.s32.totalorder %s3368_s15, %s2467_s17  ;;  %p2475_p5 = scmp.lt.s32.totalorder %s2473_s14, %s2467_s17 }
 0x37c   : > { %p2469_p1 = pnand %p2468_p0, %p2648_p3  ;;  %p2476_p6 = por %p2475_p5, %p2474_p4 }
 0x37e   : > { %p2470_p2 = pneg %p2469_p1 }
 0x380   : > { %p2477_p7 = pnand %p2476_p6, %p2470_p2 }
 0x39d   : > { %v1436_v39 = vpop.permute.xlu0 %1435 }
 0x39e   : > { %1442 = vst.msk [vmem:[#allocation2] sm:$0xff] %vm1441_vm1, %v1436_v39 }
 0x3a5   : > { %v1460_v44 = vld [vmem:[#allocation2] sm:$0xff] }
 0x3df   : > { %v1453_v5 = vpop.permute.xlu1 %1452 }
 0x3e0   : > { %1458 = vst.msk [vmem:[#allocation2 + $0x8] sm:$0xff] %vm1441_vm1, %v1453_v5 }
 0x3e3   : > { %v1455_v14 = vpop.permute.xlu1 %1454 }
 0x3e4   : > { %1459 = vst.msk [vmem:[#allocation2 + $0x18] sm:$0xff] %vm1441_vm1, %v1455_v14 }
 0x3e7   : > { %v1438_v8 = vpop.permute.xlu1 %1437  ;;  %v1461_v2 = vld [vmem:[#allocation2 + $0x8] sm:$0xff] }
 0x3e8   : > { %1443 = vst.msk [vmem:[#allocation2 + $0x10] sm:$0xff] %vm1441_vm1, %v1438_v8  ;;  %1700 = vmatprep.mubr.bf16.mxu0 %v1461_v2 }
 0x3e9   : > { %1701 = vmatmul.mubr.bf16.vlgmr.msra.gmra.mrb[12].mxu0 %v1460_v44 }
 0x3eb   : > { %v1463_v11 = vld [vmem:[#allocation2 + $0x18] sm:$0xff] }
 0x3ec   : > { %1710 = vmatprep.mubr.bf16.mxu0 %v1463_v11 }
 0x3ef   : > { %v1462_v13 = vld [vmem:[#allocation2 + $0x10] sm:$0xff] }
 0x3f1   : > { %1711 = vmatmul.mubr.bf16.gmra.mrb[16].mxu0 %v1462_v13 }
 0x4bc   : > { %v1702_v25 = vpop.f32.mrb[12].mxu0 }
 0x4bd   : > { %v1703_v45 = vadd.f32 %v1702_v25, %v1501_v4  ;;  %v1704_v18 = vpop.f32.mrb[13].mxu0 }
 0x4be   : > { %v1705_v10 = vadd.f32 %v1704_v18, %v1505_v17  ;;  %v1706_v21 = vpop.f32.mrb[14].mxu0 }
 0x4bf   : > { %1721 = vst [vmem:[%s274_s8] sm:$0xff] %v1703_v45  ;;  %v1707_v28 = vadd.f32 %v1706_v21, %v1501_v4  ;;  %v1708_v12 = vpop.f32.mrb[15].mxu0 }
 0x4c0   : > { %1722 = vst [vmem:[%s274_s8 + $0x8] sm:$0xff] %v1705_v10  ;;  %v1709_v19 = vadd.f32 %v1708_v12, %v1505_v17 }
 0x4c1   : > { %1723 = vst [vmem:[%s274_s8 + $0x10] sm:$0xff] %v1707_v28 }
 0x4c2   : > { %1724 = vst [vmem:[%s274_s8 + $0x18] sm:$0xff] %v1709_v19 }
 0x4c4   : > { %v1712_v23 = vpop.f32.mrb[16].mxu0 }
 0x4c5   : > { %v1713_v31 = vadd.f32 %v1712_v23, %v1501_v4  ;;  %v1714_v33 = vpop.f32.mrb[17].mxu0 }
 0x4c6   : > { %v1715_v34 = vadd.f32 %v1714_v33, %v1505_v17  ;;  %v1716_v26 = vpop.f32.mrb[18].mxu0 }
 0x4c7   : > { %1725 = vst [vmem:[%s274_s8 + $0x20] sm:$0xff] %v1713_v31  ;;  %v1717_v22 = vadd.f32 %v1716_v26, %v1501_v4  ;;  %v1718_v20 = vpop.f32.mrb[19].mxu0 }
 0x4c8   : > { %1726 = vst [vmem:[%s274_s8 + $0x28] sm:$0xff] %v1715_v34  ;;  %v1719_v29 = vadd.f32 %v1718_v20, %v1505_v17 }
 0x4c9   : > { %1727 = vst [vmem:[%s274_s8 + $0x30] sm:$0xff] %v1717_v22 }
 0x4ca   : > { %1728 = vst [vmem:[%s274_s8 + $0x38] sm:$0xff] %v1719_v29 }
 0x4cb   : > { %2480 = shalt.err (!%p2477_p7)
}
 0x4cc   : > { %s2481_s27 = scalar_lea.hbm %s3366_s12, 1024  ;;  %s2485_s9 = scalar_lea.hbm %s3429_s5, 8192 }
 0x4cd   : > { %p2482_p9 = scmp.ne.s32.totalorder %s3366_s12, %s2481_s27  ;;  %p2486_p12 = scmp.lt.u32.totalorder %s3366_s12, %s3429_s5 }
 0x4ce   : > { %p2487_p13 = scmp.lt.u32.totalorder %s2485_s9, %s2481_s27  ;;  %p2489_p1 = scmp.lt.u32.totalorder %s2481_s27, %s3366_s12 }
 0x4cf   : > { %p2483_p10 = pnand %p2482_p9, %p2648_p3 }
 0x4d0   : > { %p2488_p0 = por %p2487_p13, %p2486_p12 }
 0x4d1   : > { %p2484_p11 = pneg %p2483_p10 }
 0x4d2   : > { %p2490_p2 = por %p2489_p1, %p2488_p0 }
 0x4d4   : > { %p2491_p4 = pnand %p2490_p2, %p2484_p11 }
 0x4d6   : > { %2494 = shalt.err (!%p2491_p4)
}
 0x4d7   : > { %s2565_s22 = smov 256   ;;  %s2566_s17 = smov 16  }
 0x4d8   : > { %2263 = dma.vmem_to_hbm [thread:$0]  (%p2648_p3), %s3368_s15, 1024, %s3366_s12, %s3372_s16, %s2565_s22, %s2565_s22, %s2566_s17  }
 0x4d9 PF: > { %p2269_p5 = scmp.ge.s32.totalorder %s2561_s25, 2  ;;  %s1761_s26 = sand.u32 1, %s2533_s18  }
 0x4da   : > { %s1762_s13 = scalar_lea.sflag [#allocation4], %s1761_s26 }
 0x4db   : > { %p2266_p6 = pnand %p2269_p5, %p2657_p8 }
 0x4dd   : > { %2528 = dma.done.wait (!%p2266_p6), %s1762_s13, 1024  }
 0x4de   : > { %2530 = vsyncadd (!%p2266_p6), %s1762_s13, 4294966272  ;;  %s18_s25 = sadd.s32 1, %s2561_s25   ;;  %s3432_s18 = smov %s2537_s19 }
 0x4df   : > { %p15_p7 = scmp.ge.s32.totalorder %s18_s25, 10   ;;  %s3433_s19 = smov %s2541_s20 }
 0x4e0   : > { %s3434_s20 = smov %s2666_s11  ;;  %s3435_s21 = smov %s2553_s23 }
 0x4e1   : > { %s3436_s22 = smov %s2557_s24  ;;  %s3437_s23 = smov %s3440_s28 }
 0x4e2   : > { %s3438_s24 = smov %s3444_s29  ;;  %17 = sbr.rel (!%p15_p7) target bundleno = 5 (0x5), region = 81 }
 0x4e9   :  { %1767 = vsyncpa [#allocation4], 1 }
 0x4ea   :  { %1769 = vsyncpa [#allocation4 + $0x1], 1 }

</bundles_post_ra>
